<compile_context>
chip_gen: v5e
topology: v5e:2x2
jax: 0.10.0
libtpu: 0.0.40
codegen_flags: <defaults>
</compile_context>

<pallas_src>
import math
import jax
import jax.numpy as jnp
from jax.experimental import pallas as pl
from jax.experimental.pallas import tpu as pltpu

# ---- small config (same structure as the PyTorch module, scaled down) ----
D_MODEL = 32
MAXLEN = 16
N_SEGMENTS = 2
VOCAB = 4                    # {'[PAD]':0, '[CLS]':1, '[SEP]':2, '[MASK]':3}
D_K = D_V = 16
N_HEADS = 2
D_FF = D_MODEL * 4           # 128
N_LAYERS = 3
LN_EPS = 1e-5

BATCH = 2
SEQ = 8
N_PRED = 3

NEG_INF = -1e9

# ---- packed-layout constants ----
XIN_W = 64                       # emb [0:32] | addmask [32:40] | onehot [40:48] | pad
MASK_OFF = D_MODEL               # 32
OH_OFF = D_MODEL + SEQ           # 40

WMAT_W = 256                     # w_qkv [0:96] | w_o [96:128] | w1 [128:256]
QKV_W = 3 * N_HEADS * D_K        # 96

PS_ROWS = 64                     # packed parameter slab rows
# rows 0..31 : fc_w [0:32] | lin_w [32:64] | clsf_w(pad8) [64:72] | dec_w(pad8) [72:80]
ROW_FC_B, ROW_CLSF_B, ROW_LIN_B = 32, 33, 34
ROW_NRM_G, ROW_NRM_B, ROW_DEC_B = 35, 36, 37
ROW_EMB_G, ROW_EMB_B = 38, 39
LVEC_BASE, LVEC_STRIDE = 40, 8   # per-layer: bqkv | bo | ln_g | ln_b | b1 | b2

OUT_W = 128
OUT_ROWS = SEQ + 8               # rows 0..7: per-token, row 8: pooled/clsf, rows 9..11: lm


# ----------------------------- in-kernel helpers -----------------------------
def _gelu(x):
    # x * 0.5 * (1 + erf(x / sqrt(2)))  -- same as the PyTorch reference gelu
    return x * 0.5 * (1.0 + jax.lax.erf(x / math.sqrt(2.0)))


def _layernorm(x, g, b):
    mu = jnp.mean(x, axis=-1, keepdims=True)
    var = jnp.mean((x - mu) ** 2, axis=-1, keepdims=True)
    return (x - mu) * jax.lax.rsqrt(var + LN_EPS) * g + b


# --------------------------- fused whole-model kernel -------------------------
def _bert_fused_kernel(xin_ref, wmat_ref, w2mat_ref, ps_ref, out_ref):
    S, D, H, DK, DV, P = SEQ, D_MODEL, N_HEADS, D_K, D_V, N_PRED
    inv_sqrt_dk = 1.0 / math.sqrt(DK)

    # ---- unpack the activation slab for this batch element ----
    xin = xin_ref[0]                               # (S, XIN_W)
    emb = xin[:, 0:D]                              # (S, D)
    addm = xin[0:1, MASK_OFF:MASK_OFF + S]         # (1, S) additive key pad mask
    onehot = xin[0:P, OH_OFF:OH_OFF + S]           # (P, S)

    # ---- unpack the parameter slab (single VMEM load, static slices) ----
    ps = ps_ref[...]                               # (PS_ROWS, 128)
    emb_g = ps[ROW_EMB_G:ROW_EMB_G + 1, 0:D]
    emb_b = ps[ROW_EMB_B:ROW_EMB_B + 1, 0:D]

    # ---- embedding LayerNorm ----
    x = _layernorm(emb, emb_g, emb_b)              # (S, D)

    attn_cat = None
    attn_out_last = None

    # ---- encoder layers, fully unrolled ----
    for l in range(N_LAYERS):
        last = (l == N_LAYERS - 1)
        r = LVEC_BASE + LVEC_STRIDE * l
        b_qkv = ps[r:r + 1, 0:QKV_W]               # (1, 96)
        bo = ps[r + 1:r + 2, 0:D]
        ln_g = ps[r + 2:r + 3, 0:D]
        ln_b = ps[r + 3:r + 4, 0:D]
        b1 = ps[r + 4:r + 5, 0:D_FF]
        b2 = ps[r + 5:r + 6, 0:D]

        w_l = wmat_ref[l]                          # (D, 256)
        w_qkv = w_l[:, 0:QKV_W]                    # (D, 96)
        w_o = w_l[:, QKV_W:QKV_W + D]              # (H*DV, D) == (32, 32)
        w1 = w_l[:, 128:128 + D_FF]                # (D, D_FF)
        w2 = w2mat_ref[l]                          # (D_FF, D)

        x_res = x
        # one fused QKV matmul per layer
        qkv = jnp.dot(x_res, w_qkv, preferred_element_type=jnp.float32) + b_qkv   # (S, 96)

        ctx_heads = []
        a_heads = []
        for h in range(H):                         # static lane slices, one tile
            q = qkv[:, h * DK:(h + 1) * DK]
            k = qkv[:, H * DK + h * DK:H * DK + (h + 1) * DK]
            v = qkv[:, 2 * H * DK + h * DV:2 * H * DK + (h + 1) * DV]

            s = jax.lax.dot_general(q, k, (((1,), (1,)), ((), ())),
                                    preferred_element_type=jnp.float32) * inv_sqrt_dk
            s = s + addm                           # masked_fill_(mask, -1e9) equivalent
            m = jnp.max(s, axis=-1, keepdims=True)
            e = jnp.exp(s - m)
            a = e * pl.reciprocal(jnp.sum(e, axis=-1, keepdims=True), approx=True)
            a_heads.append(a)
            ctx_heads.append(jnp.dot(a, v, preferred_element_type=jnp.float32))   # (S, DV)

        ctx = jnp.concatenate(ctx_heads, axis=-1)  # (S, H*DV) == concat of heads
        proj = jnp.dot(ctx, w_o, preferred_element_type=jnp.float32) + bo
        attn_out = _layernorm(proj + x_res, ln_g, ln_b)
        if last:                                   # only the last layer is returned
            attn_cat = jnp.concatenate(a_heads, axis=-1)     # (S, H*S)
            attn_out_last = attn_out

        # Position-wise FFN (reference applies NO residual / LN here)
        h1 = _gelu(jnp.dot(attn_out, w1, preferred_element_type=jnp.float32) + b1)
        x = jnp.dot(h1, w2, preferred_element_type=jnp.float32) + b2

    # ---- heads (pooler / NSP classifier / masked-LM) ----
    fc_w = ps[0:D, 0:D]
    lin_w = ps[0:D, D:2 * D]
    clsf_w = ps[0:D, 64:72]                        # zero-padded to 8 lanes
    dec_w = ps[0:D, 72:80]                         # zero-padded to 8 lanes
    fc_b = ps[ROW_FC_B:ROW_FC_B + 1, 0:D]
    clsf_b = ps[ROW_CLSF_B:ROW_CLSF_B + 1, 0:8]
    lin_b = ps[ROW_LIN_B:ROW_LIN_B + 1, 0:D]
    nrm_g = ps[ROW_NRM_G:ROW_NRM_G + 1, 0:D]
    nrm_b = ps[ROW_NRM_B:ROW_NRM_B + 1, 0:D]
    dec_b = ps[ROW_DEC_B:ROW_DEC_B + 1, 0:8]

    cls_tok = x[0:1, :]                                                            # (1, D)
    pooled = jnp.tanh(jnp.dot(cls_tok, fc_w, preferred_element_type=jnp.float32) + fc_b)
    clsf = jnp.dot(pooled, clsf_w, preferred_element_type=jnp.float32) + clsf_b    # (1, 8)

    # masked-position gather as exact one-hot matmul
    h_masked = jnp.dot(onehot, x, preferred_element_type=jnp.float32)              # (P, D)
    lin = jnp.dot(h_masked, lin_w, preferred_element_type=jnp.float32) + lin_b
    hn = _layernorm(_gelu(lin), nrm_g, nrm_b)
    lm = jnp.dot(hn, dec_w, preferred_element_type=jnp.float32) + dec_b            # (P, 8)

    # ---- assemble ONE lane-dense output slab and store it once ----
    top = jnp.concatenate(
        [x, attn_out_last, attn_cat,
         jnp.zeros((S, OUT_W - 2 * D - H * S), jnp.float32)], axis=-1)             # (S, 128)
    head_row = jnp.concatenate(
        [clsf, pooled, jnp.zeros((1, OUT_W - 8 - D), jnp.float32)], axis=-1)       # (1, 128)
    lm_rows = jnp.concatenate(
        [lm, jnp.zeros((P, OUT_W - 8), jnp.float32)], axis=-1)                     # (P, 128)
    bottom = jnp.concatenate(
        [head_row, lm_rows,
         jnp.zeros((OUT_ROWS - S - 1 - P, OUT_W), jnp.float32)], axis=0)           # (8, 128)
    out_ref[0] = jnp.concatenate([top, bottom], axis=0)                            # (16, 128)


# ------------------------------- parameter setup -------------------------------
def init_params(key):
    def dense(k, n_in, n_out):
        k1, k2 = jax.random.split(k)
        w = jax.random.normal(k1, (n_in, n_out), jnp.float32) * 0.02
        b = jax.random.normal(k2, (1, n_out), jnp.float32) * 0.02
        return w, b

    keys = iter(jax.random.split(key, 64))
    p = {}
    p['tok_embed'] = jax.random.normal(next(keys), (VOCAB, D_MODEL), jnp.float32) * 0.02
    p['pos_embed'] = jax.random.normal(next(keys), (MAXLEN, D_MODEL), jnp.float32) * 0.02
    p['seg_embed'] = jax.random.normal(next(keys), (N_SEGMENTS, D_MODEL), jnp.float32) * 0.02
    p['emb_ln_g'] = jnp.ones((1, D_MODEL), jnp.float32)
    p['emb_ln_b'] = jnp.zeros((1, D_MODEL), jnp.float32)

    layers = []
    for _ in range(N_LAYERS):
        lp = {}
        lp['wq'], lp['bq'] = dense(next(keys), D_MODEL, N_HEADS * D_K)
        lp['wk'], lp['bk'] = dense(next(keys), D_MODEL, N_HEADS * D_K)
        lp['wv'], lp['bv'] = dense(next(keys), D_MODEL, N_HEADS * D_V)
        lp['wo'], lp['bo'] = dense(next(keys), N_HEADS * D_V, D_MODEL)
        lp['ln_g'] = jnp.ones((1, D_MODEL), jnp.float32)
        lp['ln_b'] = jnp.zeros((1, D_MODEL), jnp.float32)
        lp['w1'], lp['b1'] = dense(next(keys), D_MODEL, D_FF)
        lp['w2'], lp['b2'] = dense(next(keys), D_FF, D_MODEL)
        layers.append(lp)
    p['layers'] = layers

    p['fc_w'], p['fc_b'] = dense(next(keys), D_MODEL, D_MODEL)
    p['clsf_w'], p['clsf_b'] = dense(next(keys), D_MODEL, 2)
    p['lin_w'], p['lin_b'] = dense(next(keys), D_MODEL, D_MODEL)
    p['norm_g'] = jnp.ones((1, D_MODEL), jnp.float32)
    p['norm_b'] = jnp.zeros((1, D_MODEL), jnp.float32)
    # decoder ties the token embedding:  decoder(x) = x @ tok_embed.T + bias
    p['dec_w'] = p['tok_embed'].T                          # (D, VOCAB)
    p['dec_b'] = jnp.zeros((1, VOCAB), jnp.float32)
    return p


def pack_params(p):
    """Pack all weights into a few lane-dense slabs (done once, outside jit)."""
    wmat, w2m = [], []
    for lp in p['layers']:
        wqkv = jnp.concatenate([lp['wq'], lp['wk'], lp['wv']], axis=1)     # (D, 96)
        wmat.append(jnp.concatenate([wqkv, lp['wo'], lp['w1']], axis=1))   # (D, 256)
        w2m.append(lp['w2'])                                               # (D_FF, D)
    wmat = jnp.stack(wmat, axis=0)                                         # (L, 32, 256)
    w2mat = jnp.stack(w2m, axis=0)                                         # (L, 128, 32)

    ps = jnp.zeros((PS_ROWS, 128), jnp.float32)
    ps = ps.at[0:D_MODEL, 0:D_MODEL].set(p['fc_w'])
    ps = ps.at[0:D_MODEL, D_MODEL:2 * D_MODEL].set(p['lin_w'])
    ps = ps.at[0:D_MODEL, 64:66].set(p['clsf_w'])          # padded to 8 lanes
    ps = ps.at[0:D_MODEL, 72:72 + VOCAB].set(p['dec_w'])   # padded to 8 lanes
    ps = ps.at[ROW_FC_B, 0:D_MODEL].set(p['fc_b'][0])
    ps = ps.at[ROW_CLSF_B, 0:2].set(p['clsf_b'][0])
    ps = ps.at[ROW_LIN_B, 0:D_MODEL].set(p['lin_b'][0])
    ps = ps.at[ROW_NRM_G, 0:D_MODEL].set(p['norm_g'][0])
    ps = ps.at[ROW_NRM_B, 0:D_MODEL].set(p['norm_b'][0])
    ps = ps.at[ROW_DEC_B, 0:VOCAB].set(p['dec_b'][0])
    ps = ps.at[ROW_EMB_G, 0:D_MODEL].set(p['emb_ln_g'][0])
    ps = ps.at[ROW_EMB_B, 0:D_MODEL].set(p['emb_ln_b'][0])
    for l, lp in enumerate(p['layers']):
        r = LVEC_BASE + LVEC_STRIDE * l
        bqkv = jnp.concatenate([lp['bq'], lp['bk'], lp['bv']], axis=1)[0]  # (96,)
        ps = ps.at[r, 0:QKV_W].set(bqkv)
        ps = ps.at[r + 1, 0:D_MODEL].set(lp['bo'][0])
        ps = ps.at[r + 2, 0:D_MODEL].set(lp['ln_g'][0])
        ps = ps.at[r + 3, 0:D_MODEL].set(lp['ln_b'][0])
        ps = ps.at[r + 4, 0:D_FF].set(lp['b1'][0])
        ps = ps.at[r + 5, 0:D_MODEL].set(lp['b2'][0])

    return {'wmat': wmat, 'w2mat': w2mat, 'pslab': ps,
            'tok_embed': p['tok_embed'], 'pos_embed': p['pos_embed'],
            'seg_embed': p['seg_embed']}


# --------------------------------- forward pass --------------------------------
@jax.jit
def bert_forward(packed, input_ids, segment_ids, masked_pos):
    B, S = input_ids.shape
    pos = jnp.arange(S, dtype=jnp.int32)[None, :]

    # embedding lookups (data-dependent gathers) stay in plain JAX glue
    emb = (jnp.take(packed['tok_embed'], input_ids, axis=0)
           + jnp.take(packed['pos_embed'], pos, axis=0)
           + jnp.take(packed['seg_embed'], segment_ids, axis=0))           # (B, S, D)

    addmask = jnp.where(input_ids == 0, NEG_INF, 0.0).astype(jnp.float32)  # (B, S)
    onehot = jax.nn.one_hot(masked_pos, S, dtype=jnp.float32)              # (B, P, S)

    # one packed activation slab per batch element
    xin = jnp.zeros((B, S, XIN_W), jnp.float32)
    xin = xin.at[:, :, 0:D_MODEL].set(emb)
    xin = xin.at[:, 0, MASK_OFF:MASK_OFF + S].set(addmask)
    xin = xin.at[:, 0:N_PRED, OH_OFF:OH_OFF + S].set(onehot)

    vmem = pltpu.MemorySpace.VMEM
    out_slab = pl.pallas_call(
        _bert_fused_kernel,
        out_shape=jax.ShapeDtypeStruct((B, OUT_ROWS, OUT_W), jnp.float32),
        grid=(B,),
        in_specs=[
            pl.BlockSpec((1, S, XIN_W), lambda b: (b, 0, 0), memory_space=vmem),
            pl.BlockSpec((N_LAYERS, D_MODEL, WMAT_W), lambda b: (0, 0, 0), memory_space=vmem),
            pl.BlockSpec((N_LAYERS, D_FF, D_MODEL), lambda b: (0, 0, 0), memory_space=vmem),
            pl.BlockSpec((PS_ROWS, 128), lambda b: (0, 0), memory_space=vmem),
        ],
        out_specs=pl.BlockSpec((1, OUT_ROWS, OUT_W), lambda b: (b, 0, 0), memory_space=vmem),
        compiler_params=pltpu.CompilerParams(dimension_semantics=("parallel",)),
    )(xin, packed['wmat'], packed['w2mat'], packed['pslab'])

    # ---- unpack the single output slab ----
    output = out_slab[:, 0:S, 0:D_MODEL]
    attention_output = out_slab[:, 0:S, D_MODEL:2 * D_MODEL]
    enc_self_attn = out_slab[:, 0:S, 2 * D_MODEL:2 * D_MODEL + N_HEADS * S]
    enc_self_attn = enc_self_attn.reshape(B, S, N_HEADS, S).transpose(0, 2, 1, 3)
    logits_clsf = out_slab[:, S, 0:2]
    h_pooled = out_slab[:, S, 8:8 + D_MODEL]
    logits_lm = out_slab[:, S + 1:S + 1 + N_PRED, 0:VOCAB]
    return logits_lm, logits_clsf, h_pooled, output, attention_output, enc_self_attn


# ------------------------------------ main -------------------------------------
if __name__ == "__main__":
    key = jax.random.PRNGKey(0)
    kp, k1, k2, k3 = jax.random.split(key, 4)

    params = init_params(kp)
    packed = pack_params(params)

    input_ids = jax.random.randint(k1, (BATCH, SEQ), 0, VOCAB, dtype=jnp.int32)
    input_ids = input_ids.at[:, 0].set(1)          # [CLS]
    input_ids = input_ids.at[:, -1].set(0)         # some [PAD] to exercise the mask
    segment_ids = jax.random.randint(k2, (BATCH, SEQ), 0, N_SEGMENTS, dtype=jnp.int32)
    masked_pos = jax.random.randint(k3, (BATCH, N_PRED), 0, SEQ, dtype=jnp.int32)

    outs = bert_forward(packed, input_ids, segment_ids, masked_pos)
    outs = jax.block_until_ready(outs)

    logits_lm, logits_clsf, h_pooled, output, attention_output, enc_self_attn = outs
    assert logits_lm.shape == (BATCH, N_PRED, VOCAB)
    assert logits_clsf.shape == (BATCH, 2)
    assert h_pooled.shape == (BATCH, D_MODEL)
    assert output.shape == (BATCH, SEQ, D_MODEL)
    assert attention_output.shape == (BATCH, SEQ, D_MODEL)
    assert enc_self_attn.shape == (BATCH, N_HEADS, SEQ, SEQ)
    print("KERNEL_OK")
</pallas_src>

<mosaic_0001>
module attributes {stable_mosaic.version = 11 : i64} {
  func.func @_bert_fused_kernel(%arg0: i32, %arg1: memref<1x8x64xf32, #tpu.memory_space<vmem>>, %arg2: memref<3x32x256xf32, #tpu.memory_space<vmem>>, %arg3: memref<3x128x32xf32, #tpu.memory_space<vmem>>, %arg4: memref<64x128xf32, #tpu.memory_space<vmem>>, %arg5: memref<1x16x128xf32, #tpu.memory_space<vmem>>) attributes {dimension_semantics = [#tpu.dimension_semantics<parallel>], iteration_bounds = array<i64: 2>, scalar_prefetch = 0 : i64, scratch_operands = 0 : i64, tpu.core_type = #tpu.core_type<tc>, window_params = [{transform_indices = @transform_0, window_bounds = array<i64: 1, 8, 64>}, {pipeline_mode = #tpu.pipeline_mode<synchronous>, transform_indices = @transform_1, window_bounds = array<i64: 3, 32, 256>}, {pipeline_mode = #tpu.pipeline_mode<synchronous>, transform_indices = @transform_2, window_bounds = array<i64: 3, 128, 32>}, {pipeline_mode = #tpu.pipeline_mode<synchronous>, transform_indices = @transform_3, window_bounds = array<i64: 64, 128>}, {transform_indices = @transform_4, window_bounds = array<i64: 1, 16, 128>}]} {
    %c0 = arith.constant 0 : index
    %c0_0 = arith.constant 0 : index
    %c0_1 = arith.constant 0 : index
    %0 = vector.load %arg1[%c0, %c0_0, %c0_1] : memref<1x8x64xf32, #tpu.memory_space<vmem>>, vector<1x8x64xf32>
    %1 = vector.shape_cast %0 : vector<1x8x64xf32> to vector<8x64xf32>
    %2 = vector.extract_strided_slice %1 {offsets = [0, 0], sizes = [8, 32], strides = [1, 1]} : vector<8x64xf32> to vector<8x32xf32>
    %3 = vector.extract_strided_slice %1 {offsets = [0, 32], sizes = [1, 8], strides = [1, 1]} : vector<8x64xf32> to vector<1x8xf32>
    %4 = vector.extract_strided_slice %1 {offsets = [0, 40], sizes = [3, 8], strides = [1, 1]} : vector<8x64xf32> to vector<3x8xf32>
    %c0_2 = arith.constant 0 : index
    %c0_3 = arith.constant 0 : index
    %5 = vector.load %arg4[%c0_2, %c0_3] : memref<64x128xf32, #tpu.memory_space<vmem>>, vector<64x128xf32>
    %6 = vector.extract_strided_slice %5 {offsets = [38, 0], sizes = [1, 32], strides = [1, 1]} : vector<64x128xf32> to vector<1x32xf32>
    %7 = vector.extract_strided_slice %5 {offsets = [39, 0], sizes = [1, 32], strides = [1, 1]} : vector<64x128xf32> to vector<1x32xf32>
    %cst = arith.constant dense<0.000000e+00> : vector<8xf32>
    %8 = vector.multi_reduction <add>, %2, %cst [1] : vector<8x32xf32> to vector<8xf32>
    %9 = vector.shape_cast %8 : vector<8xf32> to vector<8x1xf32>
    %cst_4 = arith.constant 3.200000e+01 : f32
    %10 = vector.broadcast %cst_4 : f32 to vector<8x1xf32>
    %11 = arith.divf %9, %10 : vector<8x1xf32>
    %12 = vector.broadcast %11 : vector<8x1xf32> to vector<8x32xf32>
    %13 = arith.subf %2, %12 : vector<8x32xf32>
    %14 = arith.mulf %13, %13 : vector<8x32xf32>
    %cst_5 = arith.constant dense<0.000000e+00> : vector<8xf32>
    %15 = vector.multi_reduction <add>, %14, %cst_5 [1] : vector<8x32xf32> to vector<8xf32>
    %16 = vector.shape_cast %15 : vector<8xf32> to vector<8x1xf32>
    %cst_6 = arith.constant 3.200000e+01 : f32
    %17 = vector.broadcast %cst_6 : f32 to vector<8x1xf32>
    %18 = arith.divf %16, %17 : vector<8x1xf32>
    %19 = vector.broadcast %11 : vector<8x1xf32> to vector<8x32xf32>
    %20 = arith.subf %2, %19 : vector<8x32xf32>
    %cst_7 = arith.constant 9.99999974E-6 : f32
    %21 = vector.broadcast %cst_7 : f32 to vector<8x1xf32>
    %22 = arith.addf %18, %21 : vector<8x1xf32>
    %23 = math.rsqrt %22 : vector<8x1xf32>
    %24 = vector.broadcast %23 : vector<8x1xf32> to vector<8x32xf32>
    %25 = arith.mulf %20, %24 : vector<8x32xf32>
    %26 = vector.broadcast %6 : vector<1x32xf32> to vector<8x32xf32>
    %27 = arith.mulf %25, %26 : vector<8x32xf32>
    %28 = vector.broadcast %7 : vector<1x32xf32> to vector<8x32xf32>
    %29 = arith.addf %27, %28 : vector<8x32xf32>
    %30 = vector.extract_strided_slice %5 {offsets = [40, 0], sizes = [1, 96], strides = [1, 1]} : vector<64x128xf32> to vector<1x96xf32>
    %31 = vector.extract_strided_slice %5 {offsets = [41, 0], sizes = [1, 32], strides = [1, 1]} : vector<64x128xf32> to vector<1x32xf32>
    %32 = vector.extract_strided_slice %5 {offsets = [42, 0], sizes = [1, 32], strides = [1, 1]} : vector<64x128xf32> to vector<1x32xf32>
    %33 = vector.extract_strided_slice %5 {offsets = [43, 0], sizes = [1, 32], strides = [1, 1]} : vector<64x128xf32> to vector<1x32xf32>
    %34 = vector.extract_strided_slice %5 {offsets = [44, 0], sizes = [1, 128], strides = [1, 1]} : vector<64x128xf32> to vector<1x128xf32>
    %35 = vector.extract_strided_slice %5 {offsets = [45, 0], sizes = [1, 32], strides = [1, 1]} : vector<64x128xf32> to vector<1x32xf32>
    %c0_8 = arith.constant 0 : index
    %c0_9 = arith.constant 0 : index
    %c0_10 = arith.constant 0 : index
    %36 = vector.load %arg2[%c0_8, %c0_9, %c0_10] : memref<3x32x256xf32, #tpu.memory_space<vmem>>, vector<1x32x256xf32>
    %37 = vector.shape_cast %36 : vector<1x32x256xf32> to vector<32x256xf32>
    %38 = vector.extract_strided_slice %37 {offsets = [0, 0], sizes = [32, 96], strides = [1, 1]} : vector<32x256xf32> to vector<32x96xf32>
    %39 = vector.extract_strided_slice %37 {offsets = [0, 96], sizes = [32, 32], strides = [1, 1]} : vector<32x256xf32> to vector<32x32xf32>
    %40 = vector.extract_strided_slice %37 {offsets = [0, 128], sizes = [32, 128], strides = [1, 1]} : vector<32x256xf32> to vector<32x128xf32>
    %c0_11 = arith.constant 0 : index
    %c0_12 = arith.constant 0 : index
    %c0_13 = arith.constant 0 : index
    %41 = vector.load %arg3[%c0_11, %c0_12, %c0_13] : memref<3x128x32xf32, #tpu.memory_space<vmem>>, vector<1x128x32xf32>
    %42 = vector.shape_cast %41 : vector<1x128x32xf32> to vector<128x32xf32>
    %cst_14 = arith.constant dense<0.000000e+00> : vector<8x96xf32>
    %43 = tpu.matmul %29, %38, %cst_14 {dimension_numbers = #tpu.dot_dimension_numbers<[1], [0], [0], [1], [0, 0, 1, 1], [], []>} : vector<8x32xf32>, vector<32x96xf32>, vector<8x96xf32> -> vector<8x96xf32>
    %44 = vector.broadcast %30 : vector<1x96xf32> to vector<8x96xf32>
    %45 = arith.addf %43, %44 : vector<8x96xf32>
    %46 = vector.extract_strided_slice %45 {offsets = [0, 0], sizes = [8, 16], strides = [1, 1]} : vector<8x96xf32> to vector<8x16xf32>
    %47 = vector.extract_strided_slice %45 {offsets = [0, 32], sizes = [8, 16], strides = [1, 1]} : vector<8x96xf32> to vector<8x16xf32>
    %48 = vector.extract_strided_slice %45 {offsets = [0, 64], sizes = [8, 16], strides = [1, 1]} : vector<8x96xf32> to vector<8x16xf32>
    %cst_15 = arith.constant dense<0.000000e+00> : vector<8x8xf32>
    %49 = tpu.matmul %46, %47, %cst_15 {dimension_numbers = #tpu.dot_dimension_numbers<[1], [1], [0], [0], [0, 0, 1, 0], [], []>} : vector<8x16xf32>, vector<8x16xf32>, vector<8x8xf32> -> vector<8x8xf32>
    %cst_16 = arith.constant 2.500000e-01 : f32
    %50 = vector.broadcast %cst_16 : f32 to vector<8x8xf32>
    %51 = arith.mulf %49, %50 : vector<8x8xf32>
    %52 = vector.broadcast %3 : vector<1x8xf32> to vector<8x8xf32>
    %53 = arith.addf %51, %52 : vector<8x8xf32>
    %cst_17 = arith.constant dense<0xFF800000> : vector<8xf32>
    %54 = vector.multi_reduction <maximumf>, %53, %cst_17 [1] : vector<8x8xf32> to vector<8xf32>
    %55 = vector.shape_cast %54 : vector<8xf32> to vector<8x1xf32>
    %56 = vector.broadcast %55 : vector<8x1xf32> to vector<8x8xf32>
    %57 = arith.subf %53, %56 : vector<8x8xf32>
    %58 = math.exp %57 : vector<8x8xf32>
    %cst_18 = arith.constant dense<0.000000e+00> : vector<8xf32>
    %59 = vector.multi_reduction <add>, %58, %cst_18 [1] : vector<8x8xf32> to vector<8xf32>
    %60 = vector.shape_cast %59 : vector<8xf32> to vector<8x1xf32>
    %61 = tpu.reciprocal %60 {approx = true} : vector<8x1xf32> -> vector<8x1xf32>
    %62 = vector.broadcast %61 : vector<8x1xf32> to vector<8x8xf32>
    %63 = arith.mulf %58, %62 : vector<8x8xf32>
    %cst_19 = arith.constant dense<0.000000e+00> : vector<8x16xf32>
    %64 = tpu.matmul %63, %48, %cst_19 {dimension_numbers = #tpu.dot_dimension_numbers<[1], [0], [0], [1], [0, 0, 1, 1], [], []>} : vector<8x8xf32>, vector<8x16xf32>, vector<8x16xf32> -> vector<8x16xf32>
    %65 = vector.extract_strided_slice %45 {offsets = [0, 16], sizes = [8, 16], strides = [1, 1]} : vector<8x96xf32> to vector<8x16xf32>
    %66 = vector.extract_strided_slice %45 {offsets = [0, 48], sizes = [8, 16], strides = [1, 1]} : vector<8x96xf32> to vector<8x16xf32>
    %67 = vector.extract_strided_slice %45 {offsets = [0, 80], sizes = [8, 16], strides = [1, 1]} : vector<8x96xf32> to vector<8x16xf32>
    %cst_20 = arith.constant dense<0.000000e+00> : vector<8x8xf32>
    %68 = tpu.matmul %65, %66, %cst_20 {dimension_numbers = #tpu.dot_dimension_numbers<[1], [1], [0], [0], [0, 0, 1, 0], [], []>} : vector<8x16xf32>, vector<8x16xf32>, vector<8x8xf32> -> vector<8x8xf32>
    %cst_21 = arith.constant 2.500000e-01 : f32
    %69 = vector.broadcast %cst_21 : f32 to vector<8x8xf32>
    %70 = arith.mulf %68, %69 : vector<8x8xf32>
    %71 = vector.broadcast %3 : vector<1x8xf32> to vector<8x8xf32>
    %72 = arith.addf %70, %71 : vector<8x8xf32>
    %cst_22 = arith.constant dense<0xFF800000> : vector<8xf32>
    %73 = vector.multi_reduction <maximumf>, %72, %cst_22 [1] : vector<8x8xf32> to vector<8xf32>
    %74 = vector.shape_cast %73 : vector<8xf32> to vector<8x1xf32>
    %75 = vector.broadcast %74 : vector<8x1xf32> to vector<8x8xf32>
    %76 = arith.subf %72, %75 : vector<8x8xf32>
    %77 = math.exp %76 : vector<8x8xf32>
    %cst_23 = arith.constant dense<0.000000e+00> : vector<8xf32>
    %78 = vector.multi_reduction <add>, %77, %cst_23 [1] : vector<8x8xf32> to vector<8xf32>
    %79 = vector.shape_cast %78 : vector<8xf32> to vector<8x1xf32>
    %80 = tpu.reciprocal %79 {approx = true} : vector<8x1xf32> -> vector<8x1xf32>
    %81 = vector.broadcast %80 : vector<8x1xf32> to vector<8x8xf32>
    %82 = arith.mulf %77, %81 : vector<8x8xf32>
    %cst_24 = arith.constant dense<0.000000e+00> : vector<8x16xf32>
    %83 = tpu.matmul %82, %67, %cst_24 {dimension_numbers = #tpu.dot_dimension_numbers<[1], [0], [0], [1], [0, 0, 1, 1], [], []>} : vector<8x8xf32>, vector<8x16xf32>, vector<8x16xf32> -> vector<8x16xf32>
    %84 = tpu.concatenate %64, %83 in 1 : vector<8x16xf32>, vector<8x16xf32> -> vector<8x32xf32>
    %cst_25 = arith.constant dense<0.000000e+00> : vector<8x32xf32>
    %85 = tpu.matmul %84, %39, %cst_25 {dimension_numbers = #tpu.dot_dimension_numbers<[1], [0], [0], [1], [0, 0, 1, 1], [], []>} : vector<8x32xf32>, vector<32x32xf32>, vector<8x32xf32> -> vector<8x32xf32>
    %86 = vector.broadcast %31 : vector<1x32xf32> to vector<8x32xf32>
    %87 = arith.addf %85, %86 : vector<8x32xf32>
    %88 = arith.addf %87, %29 : vector<8x32xf32>
    %cst_26 = arith.constant dense<0.000000e+00> : vector<8xf32>
    %89 = vector.multi_reduction <add>, %88, %cst_26 [1] : vector<8x32xf32> to vector<8xf32>
    %90 = vector.shape_cast %89 : vector<8xf32> to vector<8x1xf32>
    %cst_27 = arith.constant 3.200000e+01 : f32
    %91 = vector.broadcast %cst_27 : f32 to vector<8x1xf32>
    %92 = arith.divf %90, %91 : vector<8x1xf32>
    %93 = vector.broadcast %92 : vector<8x1xf32> to vector<8x32xf32>
    %94 = arith.subf %88, %93 : vector<8x32xf32>
    %95 = arith.mulf %94, %94 : vector<8x32xf32>
    %cst_28 = arith.constant dense<0.000000e+00> : vector<8xf32>
    %96 = vector.multi_reduction <add>, %95, %cst_28 [1] : vector<8x32xf32> to vector<8xf32>
    %97 = vector.shape_cast %96 : vector<8xf32> to vector<8x1xf32>
    %cst_29 = arith.constant 3.200000e+01 : f32
    %98 = vector.broadcast %cst_29 : f32 to vector<8x1xf32>
    %99 = arith.divf %97, %98 : vector<8x1xf32>
    %100 = vector.broadcast %92 : vector<8x1xf32> to vector<8x32xf32>
    %101 = arith.subf %88, %100 : vector<8x32xf32>
    %cst_30 = arith.constant 9.99999974E-6 : f32
    %102 = vector.broadcast %cst_30 : f32 to vector<8x1xf32>
    %103 = arith.addf %99, %102 : vector<8x1xf32>
    %104 = math.rsqrt %103 : vector<8x1xf32>
    %105 = vector.broadcast %104 : vector<8x1xf32> to vector<8x32xf32>
    %106 = arith.mulf %101, %105 : vector<8x32xf32>
    %107 = vector.broadcast %32 : vector<1x32xf32> to vector<8x32xf32>
    %108 = arith.mulf %106, %107 : vector<8x32xf32>
    %109 = vector.broadcast %33 : vector<1x32xf32> to vector<8x32xf32>
    %110 = arith.addf %108, %109 : vector<8x32xf32>
    %cst_31 = arith.constant dense<0.000000e+00> : vector<8x128xf32>
    %111 = tpu.matmul %110, %40, %cst_31 {dimension_numbers = #tpu.dot_dimension_numbers<[1], [0], [0], [1], [0, 0, 1, 1], [], []>} : vector<8x32xf32>, vector<32x128xf32>, vector<8x128xf32> -> vector<8x128xf32>
    %112 = vector.broadcast %34 : vector<1x128xf32> to vector<8x128xf32>
    %113 = arith.addf %111, %112 : vector<8x128xf32>
    %cst_32 = arith.constant 5.000000e-01 : f32
    %114 = vector.broadcast %cst_32 : f32 to vector<8x128xf32>
    %115 = arith.mulf %113, %114 : vector<8x128xf32>
    %cst_33 = arith.constant 1.41421354 : f32
    %116 = vector.broadcast %cst_33 : f32 to vector<8x128xf32>
    %117 = arith.divf %113, %116 : vector<8x128xf32>
    %118 = math.erf %117 : vector<8x128xf32>
    %cst_34 = arith.constant 1.000000e+00 : f32
    %119 = vector.broadcast %cst_34 : f32 to vector<8x128xf32>
    %120 = arith.addf %119, %118 : vector<8x128xf32>
    %121 = arith.mulf %115, %120 : vector<8x128xf32>
    %cst_35 = arith.constant dense<0.000000e+00> : vector<8x32xf32>
    %122 = tpu.matmul %121, %42, %cst_35 {dimension_numbers = #tpu.dot_dimension_numbers<[1], [0], [0], [1], [0, 0, 1, 1], [], []>} : vector<8x128xf32>, vector<128x32xf32>, vector<8x32xf32> -> vector<8x32xf32>
    %123 = vector.broadcast %35 : vector<1x32xf32> to vector<8x32xf32>
    %124 = arith.addf %122, %123 : vector<8x32xf32>
    %125 = vector.extract_strided_slice %5 {offsets = [48, 0], sizes = [1, 96], strides = [1, 1]} : vector<64x128xf32> to vector<1x96xf32>
    %126 = vector.extract_strided_slice %5 {offsets = [49, 0], sizes = [1, 32], strides = [1, 1]} : vector<64x128xf32> to vector<1x32xf32>
    %127 = vector.extract_strided_slice %5 {offsets = [50, 0], sizes = [1, 32], strides = [1, 1]} : vector<64x128xf32> to vector<1x32xf32>
    %128 = vector.extract_strided_slice %5 {offsets = [51, 0], sizes = [1, 32], strides = [1, 1]} : vector<64x128xf32> to vector<1x32xf32>
    %129 = vector.extract_strided_slice %5 {offsets = [52, 0], sizes = [1, 128], strides = [1, 1]} : vector<64x128xf32> to vector<1x128xf32>
    %130 = vector.extract_strided_slice %5 {offsets = [53, 0], sizes = [1, 32], strides = [1, 1]} : vector<64x128xf32> to vector<1x32xf32>
    %c1 = arith.constant 1 : index
    %c0_36 = arith.constant 0 : index
    %c0_37 = arith.constant 0 : index
    %131 = vector.load %arg2[%c1, %c0_36, %c0_37] : memref<3x32x256xf32, #tpu.memory_space<vmem>>, vector<1x32x256xf32>
    %132 = vector.shape_cast %131 : vector<1x32x256xf32> to vector<32x256xf32>
    %133 = vector.extract_strided_slice %132 {offsets = [0, 0], sizes = [32, 96], strides = [1, 1]} : vector<32x256xf32> to vector<32x96xf32>
    %134 = vector.extract_strided_slice %132 {offsets = [0, 96], sizes = [32, 32], strides = [1, 1]} : vector<32x256xf32> to vector<32x32xf32>
    %135 = vector.extract_strided_slice %132 {offsets = [0, 128], sizes = [32, 128], strides = [1, 1]} : vector<32x256xf32> to vector<32x128xf32>
    %c1_38 = arith.constant 1 : index
    %c0_39 = arith.constant 0 : index
    %c0_40 = arith.constant 0 : index
    %136 = vector.load %arg3[%c1_38, %c0_39, %c0_40] : memref<3x128x32xf32, #tpu.memory_space<vmem>>, vector<1x128x32xf32>
    %137 = vector.shape_cast %136 : vector<1x128x32xf32> to vector<128x32xf32>
    %cst_41 = arith.constant dense<0.000000e+00> : vector<8x96xf32>
    %138 = tpu.matmul %124, %133, %cst_41 {dimension_numbers = #tpu.dot_dimension_numbers<[1], [0], [0], [1], [0, 0, 1, 1], [], []>} : vector<8x32xf32>, vector<32x96xf32>, vector<8x96xf32> -> vector<8x96xf32>
    %139 = vector.broadcast %125 : vector<1x96xf32> to vector<8x96xf32>
    %140 = arith.addf %138, %139 : vector<8x96xf32>
    %141 = vector.extract_strided_slice %140 {offsets = [0, 0], sizes = [8, 16], strides = [1, 1]} : vector<8x96xf32> to vector<8x16xf32>
    %142 = vector.extract_strided_slice %140 {offsets = [0, 32], sizes = [8, 16], strides = [1, 1]} : vector<8x96xf32> to vector<8x16xf32>
    %143 = vector.extract_strided_slice %140 {offsets = [0, 64], sizes = [8, 16], strides = [1, 1]} : vector<8x96xf32> to vector<8x16xf32>
    %cst_42 = arith.constant dense<0.000000e+00> : vector<8x8xf32>
    %144 = tpu.matmul %141, %142, %cst_42 {dimension_numbers = #tpu.dot_dimension_numbers<[1], [1], [0], [0], [0, 0, 1, 0], [], []>} : vector<8x16xf32>, vector<8x16xf32>, vector<8x8xf32> -> vector<8x8xf32>
    %cst_43 = arith.constant 2.500000e-01 : f32
    %145 = vector.broadcast %cst_43 : f32 to vector<8x8xf32>
    %146 = arith.mulf %144, %145 : vector<8x8xf32>
    %147 = vector.broadcast %3 : vector<1x8xf32> to vector<8x8xf32>
    %148 = arith.addf %146, %147 : vector<8x8xf32>
    %cst_44 = arith.constant dense<0xFF800000> : vector<8xf32>
    %149 = vector.multi_reduction <maximumf>, %148, %cst_44 [1] : vector<8x8xf32> to vector<8xf32>
    %150 = vector.shape_cast %149 : vector<8xf32> to vector<8x1xf32>
    %151 = vector.broadcast %150 : vector<8x1xf32> to vector<8x8xf32>
    %152 = arith.subf %148, %151 : vector<8x8xf32>
    %153 = math.exp %152 : vector<8x8xf32>
    %cst_45 = arith.constant dense<0.000000e+00> : vector<8xf32>
    %154 = vector.multi_reduction <add>, %153, %cst_45 [1] : vector<8x8xf32> to vector<8xf32>
    %155 = vector.shape_cast %154 : vector<8xf32> to vector<8x1xf32>
    %156 = tpu.reciprocal %155 {approx = true} : vector<8x1xf32> -> vector<8x1xf32>
    %157 = vector.broadcast %156 : vector<8x1xf32> to vector<8x8xf32>
    %158 = arith.mulf %153, %157 : vector<8x8xf32>
    %cst_46 = arith.constant dense<0.000000e+00> : vector<8x16xf32>
    %159 = tpu.matmul %158, %143, %cst_46 {dimension_numbers = #tpu.dot_dimension_numbers<[1], [0], [0], [1], [0, 0, 1, 1], [], []>} : vector<8x8xf32>, vector<8x16xf32>, vector<8x16xf32> -> vector<8x16xf32>
    %160 = vector.extract_strided_slice %140 {offsets = [0, 16], sizes = [8, 16], strides = [1, 1]} : vector<8x96xf32> to vector<8x16xf32>
    %161 = vector.extract_strided_slice %140 {offsets = [0, 48], sizes = [8, 16], strides = [1, 1]} : vector<8x96xf32> to vector<8x16xf32>
    %162 = vector.extract_strided_slice %140 {offsets = [0, 80], sizes = [8, 16], strides = [1, 1]} : vector<8x96xf32> to vector<8x16xf32>
    %cst_47 = arith.constant dense<0.000000e+00> : vector<8x8xf32>
    %163 = tpu.matmul %160, %161, %cst_47 {dimension_numbers = #tpu.dot_dimension_numbers<[1], [1], [0], [0], [0, 0, 1, 0], [], []>} : vector<8x16xf32>, vector<8x16xf32>, vector<8x8xf32> -> vector<8x8xf32>
    %cst_48 = arith.constant 2.500000e-01 : f32
    %164 = vector.broadcast %cst_48 : f32 to vector<8x8xf32>
    %165 = arith.mulf %163, %164 : vector<8x8xf32>
    %166 = vector.broadcast %3 : vector<1x8xf32> to vector<8x8xf32>
    %167 = arith.addf %165, %166 : vector<8x8xf32>
    %cst_49 = arith.constant dense<0xFF800000> : vector<8xf32>
    %168 = vector.multi_reduction <maximumf>, %167, %cst_49 [1] : vector<8x8xf32> to vector<8xf32>
    %169 = vector.shape_cast %168 : vector<8xf32> to vector<8x1xf32>
    %170 = vector.broadcast %169 : vector<8x1xf32> to vector<8x8xf32>
    %171 = arith.subf %167, %170 : vector<8x8xf32>
    %172 = math.exp %171 : vector<8x8xf32>
    %cst_50 = arith.constant dense<0.000000e+00> : vector<8xf32>
    %173 = vector.multi_reduction <add>, %172, %cst_50 [1] : vector<8x8xf32> to vector<8xf32>
    %174 = vector.shape_cast %173 : vector<8xf32> to vector<8x1xf32>
    %175 = tpu.reciprocal %174 {approx = true} : vector<8x1xf32> -> vector<8x1xf32>
    %176 = vector.broadcast %175 : vector<8x1xf32> to vector<8x8xf32>
    %177 = arith.mulf %172, %176 : vector<8x8xf32>
    %cst_51 = arith.constant dense<0.000000e+00> : vector<8x16xf32>
    %178 = tpu.matmul %177, %162, %cst_51 {dimension_numbers = #tpu.dot_dimension_numbers<[1], [0], [0], [1], [0, 0, 1, 1], [], []>} : vector<8x8xf32>, vector<8x16xf32>, vector<8x16xf32> -> vector<8x16xf32>
    %179 = tpu.concatenate %159, %178 in 1 : vector<8x16xf32>, vector<8x16xf32> -> vector<8x32xf32>
    %cst_52 = arith.constant dense<0.000000e+00> : vector<8x32xf32>
    %180 = tpu.matmul %179, %134, %cst_52 {dimension_numbers = #tpu.dot_dimension_numbers<[1], [0], [0], [1], [0, 0, 1, 1], [], []>} : vector<8x32xf32>, vector<32x32xf32>, vector<8x32xf32> -> vector<8x32xf32>
    %181 = vector.broadcast %126 : vector<1x32xf32> to vector<8x32xf32>
    %182 = arith.addf %180, %181 : vector<8x32xf32>
    %183 = arith.addf %182, %124 : vector<8x32xf32>
    %cst_53 = arith.constant dense<0.000000e+00> : vector<8xf32>
    %184 = vector.multi_reduction <add>, %183, %cst_53 [1] : vector<8x32xf32> to vector<8xf32>
    %185 = vector.shape_cast %184 : vector<8xf32> to vector<8x1xf32>
    %cst_54 = arith.constant 3.200000e+01 : f32
    %186 = vector.broadcast %cst_54 : f32 to vector<8x1xf32>
    %187 = arith.divf %185, %186 : vector<8x1xf32>
    %188 = vector.broadcast %187 : vector<8x1xf32> to vector<8x32xf32>
    %189 = arith.subf %183, %188 : vector<8x32xf32>
    %190 = arith.mulf %189, %189 : vector<8x32xf32>
    %cst_55 = arith.constant dense<0.000000e+00> : vector<8xf32>
    %191 = vector.multi_reduction <add>, %190, %cst_55 [1] : vector<8x32xf32> to vector<8xf32>
    %192 = vector.shape_cast %191 : vector<8xf32> to vector<8x1xf32>
    %cst_56 = arith.constant 3.200000e+01 : f32
    %193 = vector.broadcast %cst_56 : f32 to vector<8x1xf32>
    %194 = arith.divf %192, %193 : vector<8x1xf32>
    %195 = vector.broadcast %187 : vector<8x1xf32> to vector<8x32xf32>
    %196 = arith.subf %183, %195 : vector<8x32xf32>
    %cst_57 = arith.constant 9.99999974E-6 : f32
    %197 = vector.broadcast %cst_57 : f32 to vector<8x1xf32>
    %198 = arith.addf %194, %197 : vector<8x1xf32>
    %199 = math.rsqrt %198 : vector<8x1xf32>
    %200 = vector.broadcast %199 : vector<8x1xf32> to vector<8x32xf32>
    %201 = arith.mulf %196, %200 : vector<8x32xf32>
    %202 = vector.broadcast %127 : vector<1x32xf32> to vector<8x32xf32>
    %203 = arith.mulf %201, %202 : vector<8x32xf32>
    %204 = vector.broadcast %128 : vector<1x32xf32> to vector<8x32xf32>
    %205 = arith.addf %203, %204 : vector<8x32xf32>
    %cst_58 = arith.constant dense<0.000000e+00> : vector<8x128xf32>
    %206 = tpu.matmul %205, %135, %cst_58 {dimension_numbers = #tpu.dot_dimension_numbers<[1], [0], [0], [1], [0, 0, 1, 1], [], []>} : vector<8x32xf32>, vector<32x128xf32>, vector<8x128xf32> -> vector<8x128xf32>
    %207 = vector.broadcast %129 : vector<1x128xf32> to vector<8x128xf32>
    %208 = arith.addf %206, %207 : vector<8x128xf32>
    %cst_59 = arith.constant 5.000000e-01 : f32
    %209 = vector.broadcast %cst_59 : f32 to vector<8x128xf32>
    %210 = arith.mulf %208, %209 : vector<8x128xf32>
    %cst_60 = arith.constant 1.41421354 : f32
    %211 = vector.broadcast %cst_60 : f32 to vector<8x128xf32>
    %212 = arith.divf %208, %211 : vector<8x128xf32>
    %213 = math.erf %212 : vector<8x128xf32>
    %cst_61 = arith.constant 1.000000e+00 : f32
    %214 = vector.broadcast %cst_61 : f32 to vector<8x128xf32>
    %215 = arith.addf %214, %213 : vector<8x128xf32>
    %216 = arith.mulf %210, %215 : vector<8x128xf32>
    %cst_62 = arith.constant dense<0.000000e+00> : vector<8x32xf32>
    %217 = tpu.matmul %216, %137, %cst_62 {dimension_numbers = #tpu.dot_dimension_numbers<[1], [0], [0], [1], [0, 0, 1, 1], [], []>} : vector<8x128xf32>, vector<128x32xf32>, vector<8x32xf32> -> vector<8x32xf32>
    %218 = vector.broadcast %130 : vector<1x32xf32> to vector<8x32xf32>
    %219 = arith.addf %217, %218 : vector<8x32xf32>
    %220 = vector.extract_strided_slice %5 {offsets = [56, 0], sizes = [1, 96], strides = [1, 1]} : vector<64x128xf32> to vector<1x96xf32>
    %221 = vector.extract_strided_slice %5 {offsets = [57, 0], sizes = [1, 32], strides = [1, 1]} : vector<64x128xf32> to vector<1x32xf32>
    %222 = vector.extract_strided_slice %5 {offsets = [58, 0], sizes = [1, 32], strides = [1, 1]} : vector<64x128xf32> to vector<1x32xf32>
    %223 = vector.extract_strided_slice %5 {offsets = [59, 0], sizes = [1, 32], strides = [1, 1]} : vector<64x128xf32> to vector<1x32xf32>
    %224 = vector.extract_strided_slice %5 {offsets = [60, 0], sizes = [1, 128], strides = [1, 1]} : vector<64x128xf32> to vector<1x128xf32>
    %225 = vector.extract_strided_slice %5 {offsets = [61, 0], sizes = [1, 32], strides = [1, 1]} : vector<64x128xf32> to vector<1x32xf32>
    %c2 = arith.constant 2 : index
    %c0_63 = arith.constant 0 : index
    %c0_64 = arith.constant 0 : index
    %226 = vector.load %arg2[%c2, %c0_63, %c0_64] : memref<3x32x256xf32, #tpu.memory_space<vmem>>, vector<1x32x256xf32>
    %227 = vector.shape_cast %226 : vector<1x32x256xf32> to vector<32x256xf32>
    %228 = vector.extract_strided_slice %227 {offsets = [0, 0], sizes = [32, 96], strides = [1, 1]} : vector<32x256xf32> to vector<32x96xf32>
    %229 = vector.extract_strided_slice %227 {offsets = [0, 96], sizes = [32, 32], strides = [1, 1]} : vector<32x256xf32> to vector<32x32xf32>
    %230 = vector.extract_strided_slice %227 {offsets = [0, 128], sizes = [32, 128], strides = [1, 1]} : vector<32x256xf32> to vector<32x128xf32>
    %c2_65 = arith.constant 2 : index
    %c0_66 = arith.constant 0 : index
    %c0_67 = arith.constant 0 : index
    %231 = vector.load %arg3[%c2_65, %c0_66, %c0_67] : memref<3x128x32xf32, #tpu.memory_space<vmem>>, vector<1x128x32xf32>
    %232 = vector.shape_cast %231 : vector<1x128x32xf32> to vector<128x32xf32>
    %cst_68 = arith.constant dense<0.000000e+00> : vector<8x96xf32>
    %233 = tpu.matmul %219, %228, %cst_68 {dimension_numbers = #tpu.dot_dimension_numbers<[1], [0], [0], [1], [0, 0, 1, 1], [], []>} : vector<8x32xf32>, vector<32x96xf32>, vector<8x96xf32> -> vector<8x96xf32>
    %234 = vector.broadcast %220 : vector<1x96xf32> to vector<8x96xf32>
    %235 = arith.addf %233, %234 : vector<8x96xf32>
    %236 = vector.extract_strided_slice %235 {offsets = [0, 0], sizes = [8, 16], strides = [1, 1]} : vector<8x96xf32> to vector<8x16xf32>
    %237 = vector.extract_strided_slice %235 {offsets = [0, 32], sizes = [8, 16], strides = [1, 1]} : vector<8x96xf32> to vector<8x16xf32>
    %238 = vector.extract_strided_slice %235 {offsets = [0, 64], sizes = [8, 16], strides = [1, 1]} : vector<8x96xf32> to vector<8x16xf32>
    %cst_69 = arith.constant dense<0.000000e+00> : vector<8x8xf32>
    %239 = tpu.matmul %236, %237, %cst_69 {dimension_numbers = #tpu.dot_dimension_numbers<[1], [1], [0], [0], [0, 0, 1, 0], [], []>} : vector<8x16xf32>, vector<8x16xf32>, vector<8x8xf32> -> vector<8x8xf32>
    %cst_70 = arith.constant 2.500000e-01 : f32
    %240 = vector.broadcast %cst_70 : f32 to vector<8x8xf32>
    %241 = arith.mulf %239, %240 : vector<8x8xf32>
    %242 = vector.broadcast %3 : vector<1x8xf32> to vector<8x8xf32>
    %243 = arith.addf %241, %242 : vector<8x8xf32>
    %cst_71 = arith.constant dense<0xFF800000> : vector<8xf32>
    %244 = vector.multi_reduction <maximumf>, %243, %cst_71 [1] : vector<8x8xf32> to vector<8xf32>
    %245 = vector.shape_cast %244 : vector<8xf32> to vector<8x1xf32>
    %246 = vector.broadcast %245 : vector<8x1xf32> to vector<8x8xf32>
    %247 = arith.subf %243, %246 : vector<8x8xf32>
    %248 = math.exp %247 : vector<8x8xf32>
    %cst_72 = arith.constant dense<0.000000e+00> : vector<8xf32>
    %249 = vector.multi_reduction <add>, %248, %cst_72 [1] : vector<8x8xf32> to vector<8xf32>
    %250 = vector.shape_cast %249 : vector<8xf32> to vector<8x1xf32>
    %251 = tpu.reciprocal %250 {approx = true} : vector<8x1xf32> -> vector<8x1xf32>
    %252 = vector.broadcast %251 : vector<8x1xf32> to vector<8x8xf32>
    %253 = arith.mulf %248, %252 : vector<8x8xf32>
    %cst_73 = arith.constant dense<0.000000e+00> : vector<8x16xf32>
    %254 = tpu.matmul %253, %238, %cst_73 {dimension_numbers = #tpu.dot_dimension_numbers<[1], [0], [0], [1], [0, 0, 1, 1], [], []>} : vector<8x8xf32>, vector<8x16xf32>, vector<8x16xf32> -> vector<8x16xf32>
    %255 = vector.extract_strided_slice %235 {offsets = [0, 16], sizes = [8, 16], strides = [1, 1]} : vector<8x96xf32> to vector<8x16xf32>
    %256 = vector.extract_strided_slice %235 {offsets = [0, 48], sizes = [8, 16], strides = [1, 1]} : vector<8x96xf32> to vector<8x16xf32>
    %257 = vector.extract_strided_slice %235 {offsets = [0, 80], sizes = [8, 16], strides = [1, 1]} : vector<8x96xf32> to vector<8x16xf32>
    %cst_74 = arith.constant dense<0.000000e+00> : vector<8x8xf32>
    %258 = tpu.matmul %255, %256, %cst_74 {dimension_numbers = #tpu.dot_dimension_numbers<[1], [1], [0], [0], [0, 0, 1, 0], [], []>} : vector<8x16xf32>, vector<8x16xf32>, vector<8x8xf32> -> vector<8x8xf32>
    %cst_75 = arith.constant 2.500000e-01 : f32
    %259 = vector.broadcast %cst_75 : f32 to vector<8x8xf32>
    %260 = arith.mulf %258, %259 : vector<8x8xf32>
    %261 = vector.broadcast %3 : vector<1x8xf32> to vector<8x8xf32>
    %262 = arith.addf %260, %261 : vector<8x8xf32>
    %cst_76 = arith.constant dense<0xFF800000> : vector<8xf32>
    %263 = vector.multi_reduction <maximumf>, %262, %cst_76 [1] : vector<8x8xf32> to vector<8xf32>
    %264 = vector.shape_cast %263 : vector<8xf32> to vector<8x1xf32>
    %265 = vector.broadcast %264 : vector<8x1xf32> to vector<8x8xf32>
    %266 = arith.subf %262, %265 : vector<8x8xf32>
    %267 = math.exp %266 : vector<8x8xf32>
    %cst_77 = arith.constant dense<0.000000e+00> : vector<8xf32>
    %268 = vector.multi_reduction <add>, %267, %cst_77 [1] : vector<8x8xf32> to vector<8xf32>
    %269 = vector.shape_cast %268 : vector<8xf32> to vector<8x1xf32>
    %270 = tpu.reciprocal %269 {approx = true} : vector<8x1xf32> -> vector<8x1xf32>
    %271 = vector.broadcast %270 : vector<8x1xf32> to vector<8x8xf32>
    %272 = arith.mulf %267, %271 : vector<8x8xf32>
    %cst_78 = arith.constant dense<0.000000e+00> : vector<8x16xf32>
    %273 = tpu.matmul %272, %257, %cst_78 {dimension_numbers = #tpu.dot_dimension_numbers<[1], [0], [0], [1], [0, 0, 1, 1], [], []>} : vector<8x8xf32>, vector<8x16xf32>, vector<8x16xf32> -> vector<8x16xf32>
    %274 = tpu.concatenate %254, %273 in 1 : vector<8x16xf32>, vector<8x16xf32> -> vector<8x32xf32>
    %cst_79 = arith.constant dense<0.000000e+00> : vector<8x32xf32>
    %275 = tpu.matmul %274, %229, %cst_79 {dimension_numbers = #tpu.dot_dimension_numbers<[1], [0], [0], [1], [0, 0, 1, 1], [], []>} : vector<8x32xf32>, vector<32x32xf32>, vector<8x32xf32> -> vector<8x32xf32>
    %276 = vector.broadcast %221 : vector<1x32xf32> to vector<8x32xf32>
    %277 = arith.addf %275, %276 : vector<8x32xf32>
    %278 = arith.addf %277, %219 : vector<8x32xf32>
    %cst_80 = arith.constant dense<0.000000e+00> : vector<8xf32>
    %279 = vector.multi_reduction <add>, %278, %cst_80 [1] : vector<8x32xf32> to vector<8xf32>
    %280 = vector.shape_cast %279 : vector<8xf32> to vector<8x1xf32>
    %cst_81 = arith.constant 3.200000e+01 : f32
    %281 = vector.broadcast %cst_81 : f32 to vector<8x1xf32>
    %282 = arith.divf %280, %281 : vector<8x1xf32>
    %283 = vector.broadcast %282 : vector<8x1xf32> to vector<8x32xf32>
    %284 = arith.subf %278, %283 : vector<8x32xf32>
    %285 = arith.mulf %284, %284 : vector<8x32xf32>
    %cst_82 = arith.constant dense<0.000000e+00> : vector<8xf32>
    %286 = vector.multi_reduction <add>, %285, %cst_82 [1] : vector<8x32xf32> to vector<8xf32>
    %287 = vector.shape_cast %286 : vector<8xf32> to vector<8x1xf32>
    %cst_83 = arith.constant 3.200000e+01 : f32
    %288 = vector.broadcast %cst_83 : f32 to vector<8x1xf32>
    %289 = arith.divf %287, %288 : vector<8x1xf32>
    %290 = vector.broadcast %282 : vector<8x1xf32> to vector<8x32xf32>
    %291 = arith.subf %278, %290 : vector<8x32xf32>
    %cst_84 = arith.constant 9.99999974E-6 : f32
    %292 = vector.broadcast %cst_84 : f32 to vector<8x1xf32>
    %293 = arith.addf %289, %292 : vector<8x1xf32>
    %294 = math.rsqrt %293 : vector<8x1xf32>
    %295 = vector.broadcast %294 : vector<8x1xf32> to vector<8x32xf32>
    %296 = arith.mulf %291, %295 : vector<8x32xf32>
    %297 = vector.broadcast %222 : vector<1x32xf32> to vector<8x32xf32>
    %298 = arith.mulf %296, %297 : vector<8x32xf32>
    %299 = vector.broadcast %223 : vector<1x32xf32> to vector<8x32xf32>
    %300 = arith.addf %298, %299 : vector<8x32xf32>
    %301 = tpu.concatenate %253, %272 in 1 : vector<8x8xf32>, vector<8x8xf32> -> vector<8x16xf32>
    %cst_85 = arith.constant dense<0.000000e+00> : vector<8x128xf32>
    %302 = tpu.matmul %300, %230, %cst_85 {dimension_numbers = #tpu.dot_dimension_numbers<[1], [0], [0], [1], [0, 0, 1, 1], [], []>} : vector<8x32xf32>, vector<32x128xf32>, vector<8x128xf32> -> vector<8x128xf32>
    %303 = vector.broadcast %224 : vector<1x128xf32> to vector<8x128xf32>
    %304 = arith.addf %302, %303 : vector<8x128xf32>
    %cst_86 = arith.constant 5.000000e-01 : f32
    %305 = vector.broadcast %cst_86 : f32 to vector<8x128xf32>
    %306 = arith.mulf %304, %305 : vector<8x128xf32>
    %cst_87 = arith.constant 1.41421354 : f32
    %307 = vector.broadcast %cst_87 : f32 to vector<8x128xf32>
    %308 = arith.divf %304, %307 : vector<8x128xf32>
    %309 = math.erf %308 : vector<8x128xf32>
    %cst_88 = arith.constant 1.000000e+00 : f32
    %310 = vector.broadcast %cst_88 : f32 to vector<8x128xf32>
    %311 = arith.addf %310, %309 : vector<8x128xf32>
    %312 = arith.mulf %306, %311 : vector<8x128xf32>
    %cst_89 = arith.constant dense<0.000000e+00> : vector<8x32xf32>
    %313 = tpu.matmul %312, %232, %cst_89 {dimension_numbers = #tpu.dot_dimension_numbers<[1], [0], [0], [1], [0, 0, 1, 1], [], []>} : vector<8x128xf32>, vector<128x32xf32>, vector<8x32xf32> -> vector<8x32xf32>
    %314 = vector.broadcast %225 : vector<1x32xf32> to vector<8x32xf32>
    %315 = arith.addf %313, %314 : vector<8x32xf32>
    %316 = vector.extract_strided_slice %5 {offsets = [0, 0], sizes = [32, 32], strides = [1, 1]} : vector<64x128xf32> to vector<32x32xf32>
    %317 = vector.extract_strided_slice %5 {offsets = [0, 32], sizes = [32, 32], strides = [1, 1]} : vector<64x128xf32> to vector<32x32xf32>
    %318 = vector.extract_strided_slice %5 {offsets = [0, 64], sizes = [32, 8], strides = [1, 1]} : vector<64x128xf32> to vector<32x8xf32>
    %319 = vector.extract_strided_slice %5 {offsets = [0, 72], sizes = [32, 8], strides = [1, 1]} : vector<64x128xf32> to vector<32x8xf32>
    %320 = vector.extract_strided_slice %5 {offsets = [32, 0], sizes = [1, 32], strides = [1, 1]} : vector<64x128xf32> to vector<1x32xf32>
    %321 = vector.extract_strided_slice %5 {offsets = [33, 0], sizes = [1, 8], strides = [1, 1]} : vector<64x128xf32> to vector<1x8xf32>
    %322 = vector.extract_strided_slice %5 {offsets = [34, 0], sizes = [1, 32], strides = [1, 1]} : vector<64x128xf32> to vector<1x32xf32>
    %323 = vector.extract_strided_slice %5 {offsets = [35, 0], sizes = [1, 32], strides = [1, 1]} : vector<64x128xf32> to vector<1x32xf32>
    %324 = vector.extract_strided_slice %5 {offsets = [36, 0], sizes = [1, 32], strides = [1, 1]} : vector<64x128xf32> to vector<1x32xf32>
    %325 = vector.extract_strided_slice %5 {offsets = [37, 0], sizes = [1, 8], strides = [1, 1]} : vector<64x128xf32> to vector<1x8xf32>
    %326 = vector.extract_strided_slice %315 {offsets = [0, 0], sizes = [1, 32], strides = [1, 1]} : vector<8x32xf32> to vector<1x32xf32>
    %cst_90 = arith.constant dense<0.000000e+00> : vector<1x32xf32>
    %327 = tpu.matmul %326, %316, %cst_90 {dimension_numbers = #tpu.dot_dimension_numbers<[1], [0], [0], [1], [0, 0, 1, 1], [], []>} : vector<1x32xf32>, vector<32x32xf32>, vector<1x32xf32> -> vector<1x32xf32>
    %328 = arith.addf %327, %320 : vector<1x32xf32>
    %329 = math.tanh %328 : vector<1x32xf32>
    %cst_91 = arith.constant dense<0.000000e+00> : vector<1x8xf32>
    %330 = tpu.matmul %329, %318, %cst_91 {dimension_numbers = #tpu.dot_dimension_numbers<[1], [0], [0], [1], [0, 0, 1, 1], [], []>} : vector<1x32xf32>, vector<32x8xf32>, vector<1x8xf32> -> vector<1x8xf32>
    %331 = arith.addf %330, %321 : vector<1x8xf32>
    %cst_92 = arith.constant dense<0.000000e+00> : vector<3x32xf32>
    %332 = tpu.matmul %4, %315, %cst_92 {dimension_numbers = #tpu.dot_dimension_numbers<[1], [0], [0], [1], [0, 0, 1, 1], [], []>} : vector<3x8xf32>, vector<8x32xf32>, vector<3x32xf32> -> vector<3x32xf32>
    %cst_93 = arith.constant dense<0.000000e+00> : vector<3x32xf32>
    %333 = tpu.matmul %332, %317, %cst_93 {dimension_numbers = #tpu.dot_dimension_numbers<[1], [0], [0], [1], [0, 0, 1, 1], [], []>} : vector<3x32xf32>, vector<32x32xf32>, vector<3x32xf32> -> vector<3x32xf32>
    %334 = vector.broadcast %322 : vector<1x32xf32> to vector<3x32xf32>
    %335 = arith.addf %333, %334 : vector<3x32xf32>
    %cst_94 = arith.constant 5.000000e-01 : f32
    %336 = vector.broadcast %cst_94 : f32 to vector<3x32xf32>
    %337 = arith.mulf %335, %336 : vector<3x32xf32>
    %cst_95 = arith.constant 1.41421354 : f32
    %338 = vector.broadcast %cst_95 : f32 to vector<3x32xf32>
    %339 = arith.divf %335, %338 : vector<3x32xf32>
    %340 = math.erf %339 : vector<3x32xf32>
    %cst_96 = arith.constant 1.000000e+00 : f32
    %341 = vector.broadcast %cst_96 : f32 to vector<3x32xf32>
    %342 = arith.addf %341, %340 : vector<3x32xf32>
    %343 = arith.mulf %337, %342 : vector<3x32xf32>
    %cst_97 = arith.constant dense<0.000000e+00> : vector<3xf32>
    %344 = vector.multi_reduction <add>, %343, %cst_97 [1] : vector<3x32xf32> to vector<3xf32>
    %345 = vector.shape_cast %344 : vector<3xf32> to vector<3x1xf32>
    %cst_98 = arith.constant 3.200000e+01 : f32
    %346 = vector.broadcast %cst_98 : f32 to vector<3x1xf32>
    %347 = arith.divf %345, %346 : vector<3x1xf32>
    %348 = vector.broadcast %347 : vector<3x1xf32> to vector<3x32xf32>
    %349 = arith.subf %343, %348 : vector<3x32xf32>
    %350 = arith.mulf %349, %349 : vector<3x32xf32>
    %cst_99 = arith.constant dense<0.000000e+00> : vector<3xf32>
    %351 = vector.multi_reduction <add>, %350, %cst_99 [1] : vector<3x32xf32> to vector<3xf32>
    %352 = vector.shape_cast %351 : vector<3xf32> to vector<3x1xf32>
    %cst_100 = arith.constant 3.200000e+01 : f32
    %353 = vector.broadcast %cst_100 : f32 to vector<3x1xf32>
    %354 = arith.divf %352, %353 : vector<3x1xf32>
    %355 = vector.broadcast %347 : vector<3x1xf32> to vector<3x32xf32>
    %356 = arith.subf %343, %355 : vector<3x32xf32>
    %cst_101 = arith.constant 9.99999974E-6 : f32
    %357 = vector.broadcast %cst_101 : f32 to vector<3x1xf32>
    %358 = arith.addf %354, %357 : vector<3x1xf32>
    %359 = math.rsqrt %358 : vector<3x1xf32>
    %360 = vector.broadcast %359 : vector<3x1xf32> to vector<3x32xf32>
    %361 = arith.mulf %356, %360 : vector<3x32xf32>
    %362 = vector.broadcast %323 : vector<1x32xf32> to vector<3x32xf32>
    %363 = arith.mulf %361, %362 : vector<3x32xf32>
    %364 = vector.broadcast %324 : vector<1x32xf32> to vector<3x32xf32>
    %365 = arith.addf %363, %364 : vector<3x32xf32>
    %cst_102 = arith.constant dense<0.000000e+00> : vector<3x8xf32>
    %366 = tpu.matmul %365, %319, %cst_102 {dimension_numbers = #tpu.dot_dimension_numbers<[1], [0], [0], [1], [0, 0, 1, 1], [], []>} : vector<3x32xf32>, vector<32x8xf32>, vector<3x8xf32> -> vector<3x8xf32>
    %367 = vector.broadcast %325 : vector<1x8xf32> to vector<3x8xf32>
    %368 = arith.addf %366, %367 : vector<3x8xf32>
    %cst_103 = arith.constant 0.000000e+00 : f32
    %369 = vector.broadcast %cst_103 : f32 to vector<8x48xf32>
    %370 = tpu.concatenate %315, %300, %301, %369 in 1 : vector<8x32xf32>, vector<8x32xf32>, vector<8x16xf32>, vector<8x48xf32> -> vector<8x128xf32>
    %cst_104 = arith.constant 0.000000e+00 : f32
    %371 = vector.broadcast %cst_104 : f32 to vector<1x88xf32>
    %372 = tpu.concatenate %331, %329, %371 in 1 : vector<1x8xf32>, vector<1x32xf32>, vector<1x88xf32> -> vector<1x128xf32>
    %cst_105 = arith.constant 0.000000e+00 : f32
    %373 = vector.broadcast %cst_105 : f32 to vector<3x120xf32>
    %374 = tpu.concatenate %368, %373 in 1 : vector<3x8xf32>, vector<3x120xf32> -> vector<3x128xf32>
    %cst_106 = arith.constant 0.000000e+00 : f32
    %375 = vector.broadcast %cst_106 : f32 to vector<4x128xf32>
    %376 = tpu.concatenate %372, %374, %375 in 0 : vector<1x128xf32>, vector<3x128xf32>, vector<4x128xf32> -> vector<8x128xf32>
    %377 = tpu.concatenate %370, %376 in 0 : vector<8x128xf32>, vector<8x128xf32> -> vector<16x128xf32>
    %c0_107 = arith.constant 0 : index
    %c0_108 = arith.constant 0 : index
    %c0_109 = arith.constant 0 : index
    %378 = vector.load %arg5[%c0_107, %c0_108, %c0_109] : memref<1x16x128xf32, #tpu.memory_space<vmem>>, vector<1x16x128xf32>
    %379 = vector.shape_cast %378 : vector<1x16x128xf32> to vector<16x128xf32>
    %380 = vector.shape_cast %377 : vector<16x128xf32> to vector<1x16x128xf32>
    tpu.vector_store %arg5[%c0_107, %c0_108, %c0_109], %380 {strides = array<i32>} : memref<1x16x128xf32, #tpu.memory_space<vmem>>, vector<1x16x128xf32>,
    return
  }
  func.func @transform_0(%arg0: i32) -> (i32, i32, i32) {
    %c0_i32 = arith.constant 0 : i32
    %c0_i32_0 = arith.constant 0 : i32
    %c0_i32_1 = arith.constant 0 : i32
    return %arg0, %c0_i32, %c0_i32_0 : i32, i32, i32
  }
  func.func @transform_1(%arg0: i32) -> (i32, i32, i32) {
    %c0_i32 = arith.constant 0 : i32
    %c0_i32_0 = arith.constant 0 : i32
    %c0_i32_1 = arith.constant 0 : i32
    %c0_i32_2 = arith.constant 0 : i32
    return %c0_i32, %c0_i32_0, %c0_i32_1 : i32, i32, i32
  }
  func.func @transform_2(%arg0: i32) -> (i32, i32, i32) {
    %c0_i32 = arith.constant 0 : i32
    %c0_i32_0 = arith.constant 0 : i32
    %c0_i32_1 = arith.constant 0 : i32
    %c0_i32_2 = arith.constant 0 : i32
    return %c0_i32, %c0_i32_0, %c0_i32_1 : i32, i32, i32
  }
  func.func @transform_3(%arg0: i32) -> (i32, i32) {
    %c0_i32 = arith.constant 0 : i32
    %c0_i32_0 = arith.constant 0 : i32
    %c0_i32_1 = arith.constant 0 : i32
    return %c0_i32, %c0_i32_0 : i32, i32
  }
  func.func @transform_4(%arg0: i32) -> (i32, i32, i32) {
    %c0_i32 = arith.constant 0 : i32
    %c0_i32_0 = arith.constant 0 : i32
    %c0_i32_1 = arith.constant 0 : i32
    return %arg0, %c0_i32, %c0_i32_0 : i32, i32, i32
  }
}

</mosaic_0001>

<bundles_post_ra>
// kernel: bert_forward.1
= control target key start
LH: loop header
LB: loop body
LE: loop exit
PB: predicated region body
PF: predicated region fallthrough
CT: control target
= control target key end

     0   :  { %s1873_s15 = smov 0   ;;  %s2388_s0 = inlined_call_operand.vmem [shape: f32[2,8,64], index: 0, kind: input, shape index: {}]   ;;  %s2389_s1 = inlined_call_operand.vmem [shape: f32[3,32,256], index: 1, kind: input, shape index: {}]   ;;  %s2390_s2 = inlined_call_operand.vmem [shape: f32[3,128,32], index: 2, kind: input, shape index: {}]   ;;  %s2391_s3 = inlined_call_operand.vmem [shape: f32[64,128], index: 3, kind: input, shape index: {}]   ;;  %s2392_s4 = inlined_call_operand.vmem [shape: f32[2,16,128], index: 4, kind: output, shape index: {}]  }
   0x1 LB: > { %s1603_s16 = sadd.s32 4294967295, %s1834_s15   ;;  %p1607_p0 = scmp.ge.s32.totalorder %s1834_s15, 1  ;;  %s1834_s15 = sphi %s1873_s15, %s14_s15  }
   0x2   : > { %p161_p1 = scmp.lt.s32.totalorder %s1834_s15, 3 }
   0x4   : > { %p162_p2 = pnand %p1607_p0, %p161_p1 }
   0x5   : > { %p186_p3 = scmp.lt.s32.totalorder (!%p162_p2), %s1603_s16, 1  ;;  %s1837_s7 = smov (!%p162_p2), 64  }
   0x6   : > { %165 = sbr.rel (%p162_p2) target bundleno = 6119 (0x17e7), region = 36  ;;  %s1838_s8 = smov (!%p162_p2), 96  }
   0x7   : > { %s1839_s9 = smov (!%p162_p2), 80   ;;  %s1840_s10 = smov (!%p162_p2), 112  }
   0x8   : > { %s1841_s11 = smov (!%p162_p2), 48   ;;  %s1842_s12 = smov (!%p162_p2), 32  }
   0x9   : > { %s1843_s13 = smov (!%p162_p2), 16   ;;  %s1845_s21 = smov (!%p162_p2), 56  }
   0xa   : > { %s1846_s22 = smov (!%p162_p2), 8   ;;  %s1847_s5 = smov (!%p162_p2), 88  }
   0xb   : > { %s2394_s16 = smov (!%p186_p3, %s1603_s16), 1  ;;  %vm204_vm0 = vcmask 261120   ;;  %v1836_v2 = vmov 32.0   ;;  %v1898_v14 = vld [vmem:[%s2389_s1 + $0x30] sm:$0xff]  ;;  %v1904_v15 = vld [vmem:[%s2389_s1 + $0x20] sm:$0xff]  ;;  %v1934_v36 = vld [vmem:[%s2391_s3 + $0x28] sm:$0xff] }
   0xc   : > { %s1608_s17 = sshll.u32 %s2394_s16, 3  ;;  %1778 = vrcp.f32 %v1836_v2  ;;  %278 = vmatpush.msra.mxu0 %v1898_v14  ;;  %v1909_v16 = vld [vmem:[%s2389_s1 + $0x10] sm:$0xff]  ;;  %v1914_v17 = vld [vmem:[%s2389_s1] sm:$0xff]  ;;  %v1718_v18 = vpack.i.bf16 %v1904_v15, %v1898_v14  ;;  %v262_v37 = vperm.slane %v1934_v36, 0  ;;  %vm289_vm5 = vcmask 130048  }
   0xd   : > { %s1887_s20 = scalar_lea.vmem %s2388_s0, %s1608_s17  ;;  %v1723_v19 = vpack.i.bf16 %v1914_v17, %v1909_v16  ;;  %v200_v28 = vld [vmem:[%s2391_s3 + $0x20] sm:$0xff]  ;;  %vm321_vm6 = vcmask 64512  }
   0xe   : > { %v195_v0 = vld [vmem:[%s1887_s20] sm:$0xff]  ;;  %279 = vmatpush.msra.mxu0 %v1904_v15  ;;  %v234_v30 = vperm.slane %v200_v28, 6  ;;  %v236_v33 = vperm.slane %v200_v28, 7  ;;  %v245_v28 = vld [vmem:[%s2389_s1 + $0x38] sm:$0xff] }
   0xf   : > { %v205_v1 = vsel %vm204_vm0, %v195_v0, 0.0  ;;  %v315_v40 = vperm.slane %v195_v0, 0 }
  0x10   : > { %206 = vadd.xlane.f32.xlu0 %v205_v1  ;;  %280 = vmatpush.msra.mxu0 %v1909_v16 }
  0x12   : > { %v1779_v3 = vpop.eup %1778  ;;  %281 = vmatpush.msra.mxu0 %v1914_v17 }
  0x13   : > { %v209_v4 = vmul.f32 32.0, %v1779_v3  ;;  %vm213_vm1 = vweird.f32 %v1779_v3 }
  0x15   : > { %v210_v5 = vsub.f32 1.0, %v209_v4 }
  0x17   : > { %v211_v6 = vmul.f32 %v1779_v3, %v210_v5 }
  0x19   : > { %v212_v7 = vadd.f32 %v1779_v3, %v211_v6 }
  0x1b   : > { %v1891_v8 = vsel %vm213_vm1, %v1779_v3, %v212_v7 }
  0x83   : > { %v207_v9 = vpop.xlane.xlu0 %206 }
  0x84   : > { %v215_v10 = vmul.f32 %v1891_v8, %v207_v9 }
  0x86   : > { %v216_v11 = vsub.f32 %v195_v0, %v215_v10 }
  0x88   : > { %v217_v12 = vmul.f32 %v216_v11, %v216_v11 }
  0x8a   : > { %v218_v13 = vsel %vm204_vm0, %v217_v12, 0.0 }
  0x8b   : > { %219 = vadd.xlane.f32.xlu0 %v218_v13 }
  0xfe   : > { %v220_v20 = vpop.xlane.xlu0 %219 }
  0xff   : > { %v221_v21 = vmul.f32 %v220_v20, %v1891_v8 }
 0x101   : > { %v222_v22 = vadd.f32 1e-05, %v221_v21 }
 0x103   : > { %1780 = vrsqrt.f32 %v222_v22  ;;  %vm229_vm3 = vweird.f32 %v222_v22 }
 0x109   : > { %v1781_v23 = vpop.eup %1780 }
 0x10a   : > { %v224_v24 = vmul.f32 %v1781_v23, %v222_v22  ;;  %vm230_vm2 = vweird.f32 %v1781_v23 }
 0x10b   : > { %vm231_vm4 = vmor %vm229_vm3, %vm230_vm2 }
 0x10c   : > { %v225_v25 = vmul.f32 %v1781_v23, %v224_v24 }
 0x10e   : > { %v226_v26 = vmul.f32 0.5, %v225_v25 }
 0x110   : > { %v227_v27 = vsub.f32 1.5, %v226_v26 }
 0x112   : > { %v228_v29 = vmul.f32 %v1781_v23, %v227_v27 }
 0x114   : > { %v232_v31 = vsel %vm231_vm4, %v1781_v23, %v228_v29  ;;  %v243_v29 = vld [vmem:[%s2389_s1 + $0x28] sm:$0xff] }
 0x115   : > { %v233_v32 = vmul.f32 %v232_v31, %v216_v11  ;;  %v239_v31 = vld [vmem:[%s2389_s1 + $0x8] sm:$0xff] }
 0x117   : > { %v235_v34 = vmul.f32 %v234_v30, %v233_v32  ;;  %v241_v30 = vld [vmem:[%s2389_s1 + $0x18] sm:$0xff] }
 0x119   : > { %v1927_v35 = vadd.f32 %v236_v33, %v235_v34 }
 0x11b   : > { %1611 = vmatmul.msk.f32.vlgmr.msra.gmra.mxu0 %vm204_vm0, %v1927_v35 }
 0x198   : > { %v283_v38 = vpop.f32.mrf.mxu0 }
 0x199   : > { %v284_v39 = vadd.f32 %v283_v38, %v262_v37 }
 0x19b   : > { %333 = vrot.lane.b32.xlu0 %v284_v39, %s1837_s7  ;;  %287 = vrot.lane.b32.xlu1 %v284_v39, %s1838_s8 }
 0x1a3   : > { %317 = vrot.lane.b32.xlu1 %v315_v40, %s1838_s8 }
 0x1ab   : > { %361 = vrot.lane.b32.xlu1 %v284_v39, %s1839_s9 }
 0x20d   : > { %v334_v41 = vpop.permute.xlu0 %333  ;;  %v288_v42 = vpop.permute.xlu1 %287 }
 0x20e   : > { %1612 = vmatpush.xpose.msk.msra.mxu1 %vm289_vm5, %v288_v42  ;;  %354 = vmatpush.msra.mxu3 %v334_v41  ;;  %v494_v42 = vperm.slane %v1934_v36, 2 }
 0x211   : > { %1613 = vmatmul.msk.f32.vlgmr.msra.gmra.mxu1 %vm289_vm5, %v284_v39 }
 0x215   : > { %v1943_v43 = vpop.permute.xlu1 %317 }
 0x21d   : > { %v362_v44 = vpop.permute.xlu1 %361 }
 0x21e   : > { %1615 = vmatpush.xpose.msk.msrb.mxu3 %vm289_vm5, %v362_v44 }
 0x28e   : > { %v311_v45 = vpop.f32.mrf.mxu1 }
 0x28f   : > { %v314_v46 = vmul.f32 0.25, %v311_v45 }
 0x291   : > { %v320_v47 = vadd.f32 %v1943_v43, %v314_v46  ;;  %v496_v46 = vperm.slane %v1934_v36, 3 }
 0x293   : > { %v322_v48 = vsel %vm321_vm6, %v320_v47, -inf }
 0x294   : > { %323 = vmax.xlane.f32.xlu2 %v322_v48 }
 0x307   : > { %v324_v49 = vpop.xlane.xlu2 %323 }
 0x308   : > { %v325_v50 = vsub.f32 %v320_v47, %v324_v49  ;;  %v1844_v49 = vmov 1.4142135  }
 0x30a   : > { %v326_v51 = vmul.f32 1.442695, %v325_v50 }
 0x30c   : > { %1782 = vpow2.f32 %v326_v51 }
 0x312   : > { %v1783_v52 = vpop.eup %1782 }
 0x313   : > { %v328_v53 = vsel %vm321_vm6, %v1783_v52, 0.0 }
 0x314   : > { %329 = vadd.xlane.f32.xlu2 %v328_v53  ;;  %v261_v53 = vld [vmem:[%s2390_s2 + $0x78] sm:$0xff] }
 0x315   : > { %574 = vmatpush.msrb.mxu0 %v261_v53 }
 0x32c   : > { %359 = vrot.lane.b32.xlu2 %v284_v39, %s1840_s10 }
 0x334   : > { %400 = vrot.lane.b32.xlu2 %v284_v39, %s1841_s11 }
 0x33c   : > { %1719 = vrot.lane.b32.xlu2 %v1718_v18, %s1842_s12  ;;  %v431_v18 = vperm.slane %v1934_v36, 1 }
 0x344   : > { %1724 = vrot.lane.b32.xlu2 %v1723_v19, %s1842_s12 }
 0x387   : > { %v330_v54 = vpop.xlane.xlu2 %329 }
 0x388   : > { %1784 = vrcp.f32 %v330_v54 }
 0x38e   : > { %v1785_v55 = vpop.eup %1784 }
 0x38f   : > { %v360_v56 = vpop.permute.xlu2 %359  ;;  %v332_v57 = vmul.f32 %v1785_v55, %v1783_v52  ;;  %v260_v55 = vld [vmem:[%s2390_s2 + $0x70] sm:$0xff] }
 0x390   : > { %575 = vmatpush.msrb.mxu0 %v260_v55 }
 0x391   : > { %1614 = vmatmul.msk.f32.vlgmr.msra.gmra.mxu3 %vm321_vm6, %v332_v57 }
 0x392   : > { %514 = vmatpush.msra.mxu3 %v245_v28  ;;  %v2052_v28 = vld [vmem:[%s2389_s1 + $0x60] sm:$0xff] }
 0x394   : > { %515 = vmatpush.msra.mxu3 %v243_v29 }
 0x396   : > { %516 = vmatpush.msra.mxu3 %v241_v30 }
 0x397   : > { %v401_v58 = vpop.permute.xlu2 %400 }
 0x398   : > { %421 = vmatpush.msra.mxu2 %v401_v58  ;;  %517 = vmatpush.msra.mxu3 %v239_v31  ;;  %v498_v58 = vperm.slane %v1934_v36, 4 }
 0x399   : > { %1616 = vmatmul.msk.f32.vlgmr.msrb.gmra.mxu3 %vm289_vm5, %v360_v56  ;;  %v259_v56 = vld [vmem:[%s2390_s2 + $0x68] sm:$0xff] }
 0x39a   : > { %576 = vmatpush.msrb.mxu0 %v259_v56  ;;  %v1623_v56 = vld [vmem:[%s2389_s1 + $0x50] sm:$0xff] }
 0x39f   : > { %v1720_v9 = vpop.permute.xlu2 %1719 }
 0x3a0   : > { %v1721_v10 = vunpack.i.l.bf16 %v1720_v9  ;;  %v1722_v11 = vunpack.i.h.bf16 %v1720_v9 }
 0x3a2   : > { %463 = vmatpush.msrb.mxu1 %v1721_v10  ;;  %v252_v10 = vld [vmem:[%s2390_s2 + $0x30] sm:$0xff] }
 0x3a4   : > { %464 = vmatpush.msrb.mxu1 %v1722_v11 }
 0x3a7   : > { %v1725_v12 = vpop.permute.xlu2 %1724 }
 0x3a8   : > { %v1726_v13 = vunpack.i.l.bf16 %v1725_v12  ;;  %v1727_v14 = vunpack.i.h.bf16 %v1725_v12 }
 0x3aa   : > { %465 = vmatpush.msrb.mxu1 %v1726_v13  ;;  %v251_v13 = vld [vmem:[%s2390_s2 + $0x28] sm:$0xff] }
 0x3ac   : > { %466 = vmatpush.msrb.mxu1 %v1727_v14 }
 0x414   : > { %v356_v59 = vpop.f32.mrf.mxu3 }
 0x41c   : > { %v384_v60 = vpop.f32.mrf.mxu3 }
 0x41d   : > { %v387_v61 = vmul.f32 0.25, %v384_v60  ;;  %v257_v60 = vld [vmem:[%s2390_s2 + $0x58] sm:$0xff] }
 0x41f   : > { %v388_v62 = vadd.f32 %v387_v61, %v1943_v43 }
 0x421   : > { %v389_v63 = vsel %vm321_vm6, %v388_v62, -inf }
 0x422   : > { %390 = vmax.xlane.f32.xlu1 %v389_v63 }
 0x495   : > { %v391_v0 = vpop.xlane.xlu1 %390 }
 0x496   : > { %v392_v1 = vsub.f32 %v388_v62, %v391_v0  ;;  %v256_v0 = vld [vmem:[%s2390_s2 + $0x50] sm:$0xff] }
 0x498   : > { %v393_v2 = vmul.f32 1.442695, %v392_v1 }
 0x49a   : > { %1786 = vpow2.f32 %v393_v2  ;;  %v255_v2 = vld [vmem:[%s2390_s2 + $0x48] sm:$0xff] }
 0x4a0   : > { %v1787_v3 = vpop.eup %1786 }
 0x4a1   : > { %v395_v4 = vsel %vm321_vm6, %v1787_v3, 0.0 }
 0x4a2   : > { %396 = vadd.xlane.f32.xlu0 %v395_v4  ;;  %v254_v4 = vld [vmem:[%s2390_s2 + $0x40] sm:$0xff] }
 0x515   : > { %v397_v5 = vpop.xlane.xlu0 %396 }
 0x516   : > { %1788 = vrcp.f32 %v397_v5 }
 0x51c   : > { %v1789_v6 = vpop.eup %1788 }
 0x51d   : > { %v399_v7 = vmul.f32 %v1789_v6, %v1787_v3  ;;  %v253_v6 = vld [vmem:[%s2390_s2 + $0x38] sm:$0xff] }
 0x51f   : > { %1617 = vmatmul.msk.f32.vlgmr.msra.gmra.mxu2 %vm321_vm6, %v399_v7 }
 0x5a2   : > { %v423_v15 = vpop.f32.mrf.mxu2 }
 0x5a3   : > { %427 = vrot.lane.b32.xlu2 %v423_v15, %s1843_s13 }
 0x5fd   : > { %v428_v16 = vpop.permute.xlu2 %427 }
 0x5fe   : > { %v430_v17 = vsel %vm289_vm5, %v356_v59, %v428_v16  ;;  %v258_v59 = vld [vmem:[%s2390_s2 + $0x60] sm:$0xff] }
 0x5ff   : > { %1618 = vmatmul.msk.f32.vlgmr.msrb.gmra.mxu1 %vm204_vm0, %v430_v17  ;;  %577 = vmatpush.msrb.mxu0 %v258_v59  ;;  %v250_v16 = vld [vmem:[%s2390_s2 + $0x20] sm:$0xff]  ;;  %v249_v17 = vld [vmem:[%s2390_s2 + $0x18] sm:$0xff]  ;;  %v573_v59 = vperm.slane %v1934_v36, 5 }
 0x601   : > { %578 = vmatpush.msrb.mxu0 %v257_v60 }
 0x603   : > { %579 = vmatpush.msrb.mxu0 %v256_v0 }
 0x605   : > { %580 = vmatpush.msrb.mxu0 %v255_v2 }
 0x607   : > { %581 = vmatpush.msrb.mxu0 %v254_v4 }
 0x609   : > { %582 = vmatpush.msrb.mxu0 %v253_v6 }
 0x60b   : > { %583 = vmatpush.msrb.mxu0 %v252_v10 }
 0x60d   : > { %584 = vmatpush.msrb.mxu0 %v251_v13 }
 0x60f   : > { %585 = vmatpush.msrb.mxu0 %v250_v16 }
 0x611   : > { %586 = vmatpush.msrb.mxu0 %v249_v17 }
 0x67c   : > { %v468_v19 = vpop.f32.mrf.mxu1 }
 0x67d   : > { %v469_v20 = vadd.f32 %v468_v19, %v431_v18  ;;  %v248_v19 = vld [vmem:[%s2390_s2 + $0x10] sm:$0xff] }
 0x67e   : > { %587 = vmatpush.msrb.mxu0 %v248_v19 }
 0x67f   : > { %v471_v21 = vadd.f32 %v469_v20, %v1927_v35 }
 0x681   : > { %v472_v22 = vsel %vm204_vm0, %v471_v21, 0.0 }
 0x682   : > { %473 = vadd.xlane.f32.xlu1 %v472_v22  ;;  %v247_v22 = vld [vmem:[%s2390_s2 + $0x8] sm:$0xff] }
 0x683   : > { %588 = vmatpush.msrb.mxu0 %v247_v22 }
 0x6f5   : > { %v474_v23 = vpop.xlane.xlu1 %473 }
 0x6f6   : > { %v475_v24 = vmul.f32 %v474_v23, %v1891_v8 }
 0x6f8   : > { %v476_v25 = vsub.f32 %v471_v21, %v475_v24  ;;  %v246_v24 = vld [vmem:[%s2390_s2] sm:$0xff] }
 0x6f9   : > { %589 = vmatpush.msrb.mxu0 %v246_v24 }
 0x6fa   : > { %v477_v26 = vmul.f32 %v476_v25, %v476_v25 }
 0x6fc   : > { %v478_v27 = vsel %vm204_vm0, %v477_v26, 0.0 }
 0x6fd   : > { %479 = vadd.xlane.f32.xlu2 %v478_v27  ;;  %v2047_v27 = vld [vmem:[%s2389_s1 + $0x70] sm:$0xff] }
 0x6fe   : > { %636 = vmatpush.msrb.mxu2 %v2047_v27  ;;  %v1728_v30 = vpack.i.bf16 %v2052_v28, %v2047_v27 }
 0x700   : > { %637 = vmatpush.msrb.mxu2 %v2052_v28 }
 0x702   : > { %638 = vmatpush.msrb.mxu2 %v1623_v56 }
 0x770   : > { %v480_v32 = vpop.xlane.xlu2 %479 }
 0x771   : > { %v481_v33 = vmul.f32 %v480_v32, %v1891_v8 }
 0x773   : > { %v482_v34 = vadd.f32 1e-05, %v481_v33 }
 0x775   : > { %1790 = vrsqrt.f32 %v482_v34  ;;  %vm489_vm8 = vweird.f32 %v482_v34 }
 0x776   : > { %1792 = vrcp.f32 %v1844_v49 }
 0x77b   : > { %v1791_v35 = vpop.eup %1790 }
 0x77c   : > { %v484_v37 = vmul.f32 %v1791_v35, %v482_v34  ;;  %vm490_vm7 = vweird.f32 %v1791_v35  ;;  %v1793_v50 = vpop.eup %1792 }
 0x77d   : > { %vm491_vm9 = vmor %vm489_vm8, %vm490_vm7  ;;  %v524_v51 = vmul.f32 1.4142135, %v1793_v50  ;;  %vm528_vm10 = vweird.f32 %v1793_v50 }
 0x77e   : > { %v485_v38 = vmul.f32 %v1791_v35, %v484_v37 }
 0x77f   : > { %v525_v52 = vsub.f32 1.0, %v524_v51 }
 0x780   : > { %v486_v39 = vmul.f32 0.5, %v485_v38 }
 0x781   : > { %v526_v54 = vmul.f32 %v1793_v50, %v525_v52 }
 0x782   : > { %v487_v40 = vsub.f32 1.5, %v486_v39 }
 0x783   : > { %v527_v57 = vadd.f32 %v1793_v50, %v526_v54 }
 0x784   : > { %v488_v41 = vmul.f32 %v1791_v35, %v487_v40 }
 0x785   : > { %v2005_v62 = vsel %vm528_vm10, %v1793_v50, %v527_v57  ;;  %v1621_v57 = vld [vmem:[%s2389_s1 + $0x40] sm:$0xff] }
 0x786   : > { %v492_v44 = vsel %vm491_vm9, %v1791_v35, %v488_v41  ;;  %639 = vmatpush.msrb.mxu2 %v1621_v57 }
 0x787   : > { %v493_v45 = vmul.f32 %v492_v44, %v476_v25 }
 0x789   : > { %v495_v47 = vmul.f32 %v494_v42, %v493_v45 }
 0x78b   : > { %v497_v48 = vadd.f32 %v496_v46, %v495_v47 }
 0x78d   : > { %1619 = vmatmul.msk.f32.vlgmr.msra.gmra.mxu3 %vm204_vm0, %v497_v48 }
 0x810   : > { %v519_v61 = vpop.f32.mrf.mxu3 }
 0x811   : > { %v2007_v63 = vadd.f32 %v519_v61, %v498_v58  ;;  %v1733_v58 = vpack.i.bf16 %v1621_v57, %v1623_v56  ;;  %v1624_v56 = vld [vmem:[%s2389_s1 + $0x58] sm:$0xff]  ;;  %v1622_v57 = vld [vmem:[%s2389_s1 + $0x48] sm:$0xff] }
 0x813   : > { %v530_v1 = vmul.f32 %v2005_v62, %v2007_v63  ;;  %v522_v53 = vmul.f32 0.5, %v2007_v63  ;;  %v2073_v63 = vld [vmem:[%s2391_s3 + $0x30] sm:$0xff] }
 0x814   : > { %v620_v0 = vperm.slane %v2073_v63, 0 }
 0x815   : > { %v531_v3 = vmul.f32 %v530_v1, %v530_v1 }
 0x817   : > { %v532_v5 = vmin.f32 %v531_v3, 16.0 }
 0x819   : > { %v533_v7 = vmul.f32 2.1237322e-06, %v532_v5  ;;  %v544_v9 = vmul.f32 3.8918573e-05, %v532_v5 }
 0x81b   : > { %v534_v11 = vadd.f32 0.00028619796, %v533_v7  ;;  %v545_v12 = vadd.f32 0.001143296, %v544_v9 }
 0x81d   : > { %v535_v14 = vmul.f32 %v534_v11, %v532_v5  ;;  %v546_v15 = vmul.f32 %v545_v12, %v532_v5 }
 0x81f   : > { %v547_v18 = vadd.f32 0.014752088, %v546_v15  ;;  %v536_v20 = vadd.f32 0.0036580483, %v535_v14 }
 0x821   : > { %v548_v21 = vmul.f32 %v547_v18, %v532_v5  ;;  %v537_v25 = vmul.f32 %v536_v20, %v532_v5 }
 0x823   : > { %v549_v23 = vadd.f32 0.112945676, %v548_v21  ;;  %v538_v31 = vadd.f32 0.05243302, %v537_v25 }
 0x825   : > { %v550_v26 = vmul.f32 %v549_v23, %v532_v5  ;;  %v539_v34 = vmul.f32 %v538_v31, %v532_v5 }
 0x827   : > { %v551_v29 = vadd.f32 0.4994258, %v550_v26  ;;  %v540_v35 = vadd.f32 0.18741608, %v539_v34 }
 0x829   : > { %v552_v32 = vmul.f32 %v551_v29, %v532_v5  ;;  %v541_v38 = vmul.f32 %v540_v35, %v532_v5 }
 0x82b   : > { %v553_v33 = vadd.f32 1.0, %v552_v32  ;;  %v542_v42 = vadd.f32 1.1283791, %v541_v38 }
 0x82d   : > { %1794 = vrcp.f32 %v553_v33  ;;  %v565_v41 = vand.u32 2147483648, %v553_v33  ;;  %v563_v45 = vand.u32 2147483647, %v553_v33  ;;  %vm559_vm12 = vweird.f32 %v553_v33 }
 0x82e   : > { %v543_v48 = vmul.f32 %v542_v42, %v530_v1 }
 0x82f   : > { %v566_v47 = vor.u32 1.1754944e-38, %v565_v41  ;;  %vm564_vm14 = vcmp.eq.f32.partialorder %v563_v45, 8.507059e+37 }
 0x833   : > { %v1795_v37 = vpop.eup %1794 }
 0x834   : > { %v555_v39 = vmul.f32 %v1795_v37, %v553_v33  ;;  %vm560_vm11 = vweird.f32 %v1795_v37 }
 0x835   : > { %vm561_vm13 = vmor %vm559_vm12, %vm560_vm11 }
 0x836   : > { %v556_v40 = vsub.f32 1.0, %v555_v39 }
 0x838   : > { %v557_v44 = vmul.f32 %v1795_v37, %v556_v40 }
 0x83a   : > { %v558_v46 = vadd.f32 %v1795_v37, %v557_v44  ;;  %v782_v44 = vperm.slane %v2073_v63, 1 }
 0x83c   : > { %v562_v49 = vsel %vm561_vm13, %v1795_v37, %v558_v46 }
 0x83d   : > { %v567_v50 = vsel %vm564_vm14, %v566_v47, %v562_v49 }
 0x83e   : > { %v568_v51 = vmul.f32 %v567_v50, %v543_v48 }
 0x840   : > { %v1620_v52 = vclamps-f32 %v568_v51, 1.0 }
 0x842   : > { %v571_v54 = vadd.f32 1.0, %v1620_v52 }
 0x844   : > { %v572_v55 = vmul.f32 %v571_v54, %v522_v53  ;;  %v1628_v54 = vld [vmem:[%s2389_s1 + $0x78] sm:$0xff] }
 0x846   : > { %590 = vmatmul.f32.vlgmr.msrb.gmra.mxu0 %v572_v55  ;;  %v1626_v55 = vld [vmem:[%s2389_s1 + $0x68] sm:$0xff] }
 0x8c3   : > { %v591_v60 = vpop.f32.mrf.mxu0 }
 0x8c4   : > { %v2066_v61 = vadd.f32 %v591_v60, %v573_v59 }
 0x8c6   : > { %1645 = vmatmul.msk.f32.vlgmr.msrb.gmra.mxu2 %vm204_vm0, %v2066_v61 }
 0x949   : > { %v641_v1 = vpop.f32.mrf.mxu2 }
 0x94a   : > { %v642_v2 = vadd.f32 %v641_v1, %v620_v0 }
 0x94c   : > { %710 = vrot.lane.b32.xlu0 %v642_v2, %s1840_s10  ;;  %712 = vrot.lane.b32.xlu1 %v642_v2, %s1839_s9 }
 0x954   : > { %645 = vrot.lane.b32.xlu0 %v642_v2, %s1838_s8 }
 0x9be   : > { %v711_v36 = vpop.permute.xlu0 %710  ;;  %v713_v3 = vpop.permute.xlu1 %712 }
 0x9bf   : > { %1649 = vmatpush.xpose.msk.msra.mxu2 %vm289_vm5, %v713_v3 }
 0x9c2   : > { %1650 = vmatmul.msk.f32.vlgmr.msra.gmra.mxu2 %vm289_vm5, %v711_v36 }
 0x9c3   : > { %865 = vmatpush.msrb.mxu2 %v1628_v54 }
 0x9c5   : > { %866 = vmatpush.msrb.mxu2 %v1626_v55 }
 0x9c6   : > { %v646_v4 = vpop.permute.xlu0 %645 }
 0x9c7   : > { %1646 = vmatpush.xpose.msk.msra.mxu1 %vm289_vm5, %v646_v4  ;;  %867 = vmatpush.msrb.mxu2 %v1624_v56  ;;  %v845_v4 = vperm.slane %v2073_v63, 2 }
 0x9c9   : > { %868 = vmatpush.msrb.mxu2 %v1622_v57 }
 0x9ca   : > { %1647 = vmatmul.msk.f32.vlgmr.msra.gmra.mxu1 %vm289_vm5, %v642_v2 }
 0xa45   : > { %v735_v5 = vpop.f32.mrf.mxu2 }
 0xa46   : > { %v738_v6 = vmul.f32 0.25, %v735_v5 }
 0xa47   : > { %v668_v7 = vpop.f32.mrf.mxu1 }
 0xa48   : > { %v671_v9 = vmul.f32 0.25, %v668_v7  ;;  %v739_v10 = vadd.f32 %v738_v6, %v1943_v43  ;;  %v847_v7 = vperm.slane %v2073_v63, 3 }
 0xa4a   : > { %v740_v11 = vsel %vm321_vm6, %v739_v10, -inf  ;;  %v672_v12 = vadd.f32 %v671_v9, %v1943_v43 }
 0xa4b   : > { %741 = vmax.xlane.f32.xlu1 %v740_v11  ;;  %v1644_v11 = vld [vmem:[%s2390_s2 + $0xf8] sm:$0xff] }
 0xa4c   : > { %v673_v13 = vsel %vm321_vm6, %v672_v12, -inf }
 0xa4d   : > { %674 = vmax.xlane.f32.xlu0 %v673_v13  ;;  %v1642_v13 = vld [vmem:[%s2390_s2 + $0xe8] sm:$0xff] }
 0xa61   : > { %1729 = vrot.lane.b32.xlu0 %v1728_v30, %s1842_s12 }
 0xabe   : > { %v742_v14 = vpop.xlane.xlu1 %741 }
 0xabf   : > { %v743_v15 = vsub.f32 %v739_v10, %v742_v14  ;;  %v849_v14 = vperm.slane %v2073_v63, 4 }
 0xac0   : > { %v675_v16 = vpop.xlane.xlu0 %674 }
 0xac1   : > { %v744_v17 = vmul.f32 1.442695, %v743_v15  ;;  %v676_v18 = vsub.f32 %v672_v12, %v675_v16  ;;  %v1643_v12 = vld [vmem:[%s2390_s2 + $0xf0] sm:$0xff]  ;;  %v1641_v15 = vld [vmem:[%s2390_s2 + $0xe0] sm:$0xff]  ;;  %v1640_v16 = vld [vmem:[%s2390_s2 + $0xd8] sm:$0xff] }
 0xac3   : > { %1796 = vpow2.f32 %v744_v17  ;;  %v677_v19 = vmul.f32 1.442695, %v676_v18 }
 0xac5   : > { %1798 = vpow2.f32 %v677_v19  ;;  %v1639_v19 = vld [vmem:[%s2390_s2 + $0xd0] sm:$0xff] }
 0xac9   : > { %v1797_v20 = vpop.eup %1796 }
 0xaca   : > { %v746_v21 = vsel %vm321_vm6, %v1797_v20, 0.0 }
 0xacb   : > { %v1799_v22 = vpop.eup %1798  ;;  %747 = vadd.xlane.f32.xlu2 %v746_v21  ;;  %v1638_v21 = vld [vmem:[%s2390_s2 + $0xc8] sm:$0xff] }
 0xacc   : > { %v679_v23 = vsel %vm321_vm6, %v1799_v22, 0.0 }
 0xacd   : > { %680 = vadd.xlane.f32.xlu1 %v679_v23  ;;  %v1637_v23 = vld [vmem:[%s2390_s2 + $0xc0] sm:$0xff] }
 0xad3   : > { %v1730_v32 = vpop.permute.xlu0 %1729 }
 0xad4   : > { %v1732_v34 = vunpack.i.h.bf16 %v1730_v32  ;;  %v1731_v35 = vunpack.i.l.bf16 %v1730_v32 }
 0xae3   : > { %751 = vrot.lane.b32.xlu2 %v642_v2, %s1841_s11 }
 0xae6   : > { %1734 = vrot.lane.b32.xlu1 %v1733_v58, %s1842_s12 }
 0xaeb   : > { %684 = vrot.lane.b32.xlu2 %v642_v2, %s1837_s7 }
 0xb3e   : > { %v748_v24 = vpop.xlane.xlu2 %747 }
 0xb3f   : > { %1800 = vrcp.f32 %v748_v24 }
 0xb40   : > { %v681_v25 = vpop.xlane.xlu1 %680 }
 0xb41   : > { %1802 = vrcp.f32 %v681_v25  ;;  %v1636_v25 = vld [vmem:[%s2390_s2 + $0xb8] sm:$0xff] }
 0xb45   : > { %v1801_v26 = vpop.eup %1800 }
 0xb46   : > { %v750_v27 = vmul.f32 %v1801_v26, %v1797_v20  ;;  %v752_v28 = vpop.permute.xlu2 %751 }
 0xb47   : > { %772 = vmatpush.msrb.mxu1 %v752_v28  ;;  %v1803_v29 = vpop.eup %1802  ;;  %v1635_v28 = vld [vmem:[%s2390_s2 + $0xb0] sm:$0xff] }
 0xb48   : > { %1651 = vmatmul.msk.f32.vlgmr.msrb.gmra.mxu1 %vm321_vm6, %v750_v27  ;;  %v683_v30 = vmul.f32 %v1803_v29, %v1799_v22 }
 0xb49   : > { %918 = vmatpush.msra.mxu1 %v1644_v11 }
 0xb4b   : > { %919 = vmatpush.msra.mxu1 %v1643_v12  ;;  %v1657_v12 = vld [vmem:[%s2389_s1 + $0x90] sm:$0xff] }
 0xb4d   : > { %920 = vmatpush.msra.mxu1 %v1642_v13  ;;  %v1655_v13 = vld [vmem:[%s2389_s1 + $0x80] sm:$0xff] }
 0xb4e   : > { %v685_v31 = vpop.permute.xlu2 %684 }
 0xb4f   : > { %705 = vmatpush.msrb.mxu3 %v685_v31  ;;  %921 = vmatpush.msra.mxu1 %v1641_v15  ;;  %v1634_v31 = vld [vmem:[%s2390_s2 + $0xa8] sm:$0xff]  ;;  %v917_v15 = vperm.slane %v2073_v63, 5 }
 0xb50   : > { %1648 = vmatmul.msk.f32.vlgmr.msrb.gmra.mxu3 %vm321_vm6, %v683_v30 }
 0xb51   : > { %814 = vmatpush.msra.mxu3 %v1731_v35  ;;  %922 = vmatpush.msra.mxu1 %v1640_v16 }
 0xb53   : > { %815 = vmatpush.msra.mxu3 %v1732_v34  ;;  %923 = vmatpush.msra.mxu1 %v1639_v19  ;;  %v1633_v34 = vld [vmem:[%s2390_s2 + $0xa0] sm:$0xff] }
 0xb55   : > { %924 = vmatpush.msra.mxu1 %v1638_v21 }
 0xb57   : > { %925 = vmatpush.msra.mxu1 %v1637_v23 }
 0xb58   : > { %v1735_v33 = vpop.permute.xlu1 %1734 }
 0xb59   : > { %v1736_v37 = vunpack.i.l.bf16 %v1735_v33  ;;  %v1737_v38 = vunpack.i.h.bf16 %v1735_v33  ;;  %926 = vmatpush.msra.mxu1 %v1636_v25 }
 0xb5b   : > { %816 = vmatpush.msra.mxu3 %v1736_v37  ;;  %927 = vmatpush.msra.mxu1 %v1635_v28  ;;  %v1632_v37 = vld [vmem:[%s2390_s2 + $0x98] sm:$0xff] }
 0xb5d   : > { %817 = vmatpush.msra.mxu3 %v1737_v38  ;;  %928 = vmatpush.msra.mxu1 %v1634_v31 }
 0xb5f   : > { %929 = vmatpush.msra.mxu1 %v1633_v34 }
 0xb61   : > { %930 = vmatpush.msra.mxu1 %v1632_v37 }
 0xbc5   : > { %v774_v39 = vpop.f32.mrf.mxu1 }
 0xbc6   : > { %778 = vrot.lane.b32.xlu2 %v774_v39, %s1843_s13 }
 0xbd3   : > { %v707_v40 = vpop.f32.mrf.mxu3 }
 0xc20   : > { %v779_v41 = vpop.permute.xlu2 %778 }
 0xc21   : > { %v781_v42 = vsel %vm289_vm5, %v707_v40, %v779_v41  ;;  %v1631_v40 = vld [vmem:[%s2390_s2 + $0x90] sm:$0xff] }
 0xc22   : > { %1652 = vmatmul.msk.f32.vlgmr.msra.gmra.mxu3 %vm204_vm0, %v781_v42  ;;  %931 = vmatpush.msra.mxu1 %v1631_v40  ;;  %v1630_v42 = vld [vmem:[%s2390_s2 + $0x88] sm:$0xff] }
 0xc24   : > { %932 = vmatpush.msra.mxu1 %v1630_v42 }
 0xca5   : > { %v819_v45 = vpop.f32.mrf.mxu3 }
 0xca6   : > { %v820_v46 = vadd.f32 %v819_v45, %v782_v44  ;;  %v1629_v45 = vld [vmem:[%s2390_s2 + $0x80] sm:$0xff] }
 0xca7   : > { %933 = vmatpush.msra.mxu1 %v1629_v45 }
 0xca8   : > { %v822_v47 = vadd.f32 %v820_v46, %v2066_v61 }
 0xcaa   : > { %v823_v48 = vsel %vm204_vm0, %v822_v47, 0.0 }
 0xcab   : > { %824 = vadd.xlane.f32.xlu2 %v823_v48  ;;  %v2183_v48 = vld [vmem:[%s2389_s1 + $0xa0] sm:$0xff] }
 0xd1e   : > { %v825_v49 = vpop.xlane.xlu2 %824 }
 0xd1f   : > { %v826_v50 = vmul.f32 %v825_v49, %v1891_v8 }
 0xd21   : > { %v827_v51 = vsub.f32 %v822_v47, %v826_v50  ;;  %v2178_v47 = vld [vmem:[%s2389_s1 + $0xb0] sm:$0xff] }
 0xd22   : > { %980 = vmatpush.msrb.mxu3 %v2178_v47  ;;  %v1738_v50 = vpack.i.bf16 %v2183_v48, %v2178_v47 }
 0xd23   : > { %v828_v52 = vmul.f32 %v827_v51, %v827_v51 }
 0xd24   : > { %981 = vmatpush.msrb.mxu3 %v2183_v48 }
 0xd25   : > { %v829_v53 = vsel %vm204_vm0, %v828_v52, 0.0 }
 0xd26   : > { %830 = vadd.xlane.f32.xlu0 %v829_v53  ;;  %982 = vmatpush.msrb.mxu3 %v1657_v12 }
 0xd28   : > { %983 = vmatpush.msrb.mxu3 %v1655_v13 }
 0xd99   : > { %v831_v58 = vpop.xlane.xlu0 %830 }
 0xd9a   : > { %v832_v59 = vmul.f32 %v831_v58, %v1891_v8 }
 0xd9c   : > { %v833_v60 = vadd.f32 1e-05, %v832_v59 }
 0xd9e   : > { %1804 = vrsqrt.f32 %v833_v60  ;;  %vm840_vm1 = vweird.f32 %v833_v60 }
 0xda4   : > { %v1805_v61 = vpop.eup %1804 }
 0xda5   : > { %v835_v0 = vmul.f32 %v1805_v61, %v833_v60  ;;  %vm841_vm15 = vweird.f32 %v1805_v61 }
 0xda6   : > { %vm842_vm2 = vmor %vm840_vm1, %vm841_vm15 }
 0xda7   : > { %v836_v1 = vmul.f32 %v1805_v61, %v835_v0 }
 0xda9   : > { %v837_v2 = vmul.f32 0.5, %v836_v1 }
 0xdab   : > { %v838_v36 = vsub.f32 1.5, %v837_v2 }
 0xdad   : > { %v839_v3 = vmul.f32 %v1805_v61, %v838_v36 }
 0xdaf   : > { %v843_v5 = vsel %vm842_vm2, %v1805_v61, %v839_v3 }
 0xdb0   : > { %v844_v6 = vmul.f32 %v843_v5, %v827_v51 }
 0xdb2   : > { %v846_v9 = vmul.f32 %v845_v4, %v844_v6 }
 0xdb4   : > { %v848_v10 = vadd.f32 %v847_v7, %v846_v9 }
 0xdb6   : > { %1653 = vmatmul.msk.f32.vlgmr.msrb.gmra.mxu2 %vm204_vm0, %v848_v10 }
 0xe39   : > { %v870_v17 = vpop.f32.mrf.mxu2 }
 0xe3a   : > { %v2138_v18 = vadd.f32 %v870_v17, %v849_v14  ;;  %v1743_v14 = vpack.i.bf16 %v1655_v13, %v1657_v12  ;;  %v1662_v12 = vld [vmem:[%s2389_s1 + $0xb8] sm:$0xff]  ;;  %v1660_v13 = vld [vmem:[%s2389_s1 + $0xa8] sm:$0xff] }
 0xe3c   : > { %v874_v20 = vmul.f32 %v2138_v18, %v2005_v62  ;;  %v873_v9 = vmul.f32 0.5, %v2138_v18  ;;  %v2204_v18 = vld [vmem:[%s2391_s3 + $0x38] sm:$0xff] }
 0xe3d   : > { %v964_v19 = vperm.slane %v2204_v18, 0 }
 0xe3e   : > { %v875_v22 = vmul.f32 %v874_v20, %v874_v20 }
 0xe40   : > { %v876_v24 = vmin.f32 %v875_v22, 16.0 }
 0xe42   : > { %v877_v26 = vmul.f32 2.1237322e-06, %v876_v24  ;;  %v888_v27 = vmul.f32 3.8918573e-05, %v876_v24 }
 0xe44   : > { %v878_v29 = vadd.f32 0.00028619796, %v877_v26  ;;  %v889_v30 = vadd.f32 0.001143296, %v888_v27 }
 0xe46   : > { %v879_v32 = vmul.f32 %v878_v29, %v876_v24  ;;  %v890_v33 = vmul.f32 %v889_v30, %v876_v24 }
 0xe48   : > { %v891_v35 = vadd.f32 0.014752088, %v890_v33  ;;  %v880_v38 = vadd.f32 0.0036580483, %v879_v32 }
 0xe4a   : > { %v892_v39 = vmul.f32 %v891_v35, %v876_v24  ;;  %v881_v44 = vmul.f32 %v880_v38, %v876_v24 }
 0xe4c   : > { %v893_v41 = vadd.f32 0.112945676, %v892_v39  ;;  %v882_v51 = vadd.f32 0.05243302, %v881_v44 }
 0xe4e   : > { %v894_v46 = vmul.f32 %v893_v41, %v876_v24  ;;  %v883_v54 = vmul.f32 %v882_v51, %v876_v24 }
 0xe50   : > { %v895_v49 = vadd.f32 0.4994258, %v894_v46  ;;  %v884_v55 = vadd.f32 0.18741608, %v883_v54 }
 0xe52   : > { %v896_v52 = vmul.f32 %v895_v49, %v876_v24  ;;  %v885_v57 = vmul.f32 %v884_v55, %v876_v24 }
 0xe54   : > { %v897_v53 = vadd.f32 1.0, %v896_v52  ;;  %v886_v61 = vadd.f32 1.1283791, %v885_v57 }
 0xe56   : > { %1806 = vrcp.f32 %v897_v53  ;;  %v909_v60 = vand.u32 2147483648, %v897_v53  ;;  %v907_v1 = vand.u32 2147483647, %v897_v53  ;;  %vm903_vm4 = vweird.f32 %v897_v53 }
 0xe57   : > { %v887_v3 = vmul.f32 %v886_v61, %v874_v20  ;;  %v1126_v61 = vperm.slane %v2204_v18, 1 }
 0xe58   : > { %v910_v36 = vor.u32 1.1754944e-38, %v909_v60  ;;  %vm908_vm8 = vcmp.eq.f32.partialorder %v907_v1, 8.507059e+37 }
 0xe5c   : > { %v1807_v56 = vpop.eup %1806 }
 0xe5d   : > { %v899_v58 = vmul.f32 %v1807_v56, %v897_v53  ;;  %vm904_vm3 = vweird.f32 %v1807_v56 }
 0xe5e   : > { %vm905_vm7 = vmor %vm903_vm4, %vm904_vm3  ;;  %vm1457_vm4 = vcmask 256000  }
 0xe5f   : > { %v900_v59 = vsub.f32 1.0, %v899_v58 }
 0xe61   : > { %v901_v0 = vmul.f32 %v1807_v56, %v900_v59 }
 0xe63   : > { %v902_v2 = vadd.f32 %v1807_v56, %v901_v0 }
 0xe65   : > { %v906_v4 = vsel %vm905_vm7, %v1807_v56, %v902_v2 }
 0xe66   : > { %v911_v5 = vsel %vm908_vm8, %v910_v36, %v906_v4  ;;  %v198_v4 = vld [vmem:[%s2391_s3 + $0x10] sm:$0xff] }
 0xe67   : > { %v912_v6 = vmul.f32 %v911_v5, %v887_v3  ;;  %v199_v3 = vld [vmem:[%s2391_s3 + $0x18] sm:$0xff] }
 0xe69   : > { %v1654_v7 = vclamps-f32 %v912_v6, 1.0 }
 0xe6b   : > { %v915_v10 = vadd.f32 1.0, %v1654_v7 }
 0xe6d   : > { %v916_v11 = vmul.f32 %v915_v10, %v873_v9 }
 0xe6f   : > { %934 = vmatmul.f32.vlgmr.msra.gmra.mxu1 %v916_v11  ;;  %v2246_v11 = vpack.i.bf16 %v198_v4, %v199_v3 }
 0xeec   : > { %v935_v16 = vpop.f32.mrf.mxu1 }
 0xeed   : > { %v2197_v17 = vadd.f32 %v935_v16, %v917_v15  ;;  %v1656_v15 = vld [vmem:[%s2389_s1 + $0x88] sm:$0xff] }
 0xeef   : > { %1679 = vmatmul.msk.f32.vlgmr.msrb.gmra.mxu3 %vm204_vm0, %v2197_v17 }
 0xf72   : > { %v985_v20 = vpop.f32.mrf.mxu3 }
 0xf73   : > { %v986_v21 = vadd.f32 %v985_v20, %v964_v19 }
 0xf75   : > { %1056 = vrot.lane.b32.xlu1 %v986_v21, %s1839_s9 }
 0xf7d   : > { %1054 = vrot.lane.b32.xlu1 %v986_v21, %s1840_s10 }
 0xf85   : > { %989 = vrot.lane.b32.xlu1 %v986_v21, %s1838_s8 }
 0xfe7   : > { %v1057_v63 = vpop.permute.xlu1 %1056 }
 0xfe8   : > { %1683 = vmatpush.xpose.msk.msra.mxu0 %vm289_vm5, %v1057_v63 }
 0xfec   : > { %1213 = vmatpush.msrb.mxu0 %v1662_v12 }
 0xfee   : > { %1214 = vmatpush.msrb.mxu0 %v1660_v13 }
 0xfef   : > { %v1055_v22 = vpop.permute.xlu1 %1054 }
 0xff0   : > { %1684 = vmatmul.msk.f32.vlgmr.msra.gmra.mxu0 %vm289_vm5, %v1055_v22 }
 0xff7   : > { %v990_v23 = vpop.permute.xlu1 %989 }
 0xff8   : > { %1680 = vmatpush.xpose.msk.msra.mxu2 %vm289_vm5, %v990_v23 }
 0xffb   : > { %1681 = vmatmul.msk.f32.vlgmr.msra.gmra.mxu2 %vm289_vm5, %v986_v21 }
0x106d   : > { %v1079_v24 = vpop.f32.mrf.mxu0 }
0x106e   : > { %v1082_v25 = vmul.f32 0.25, %v1079_v24 }
0x1070   : > { %v1083_v26 = vadd.f32 %v1082_v25, %v1943_v43 }
0x1072   : > { %v1084_v27 = vsel %vm321_vm6, %v1083_v26, -inf }
0x1073   : > { %1085 = vmax.xlane.f32.xlu1 %v1084_v27 }
0x107e   : > { %v1012_v28 = vpop.f32.mrf.mxu2 }
0x107f   : > { %v1015_v29 = vmul.f32 0.25, %v1012_v28 }
0x1081   : > { %v1016_v30 = vadd.f32 %v1015_v29, %v1943_v43  ;;  %v1189_v29 = vperm.slane %v2204_v18, 2 }
0x1083   : > { %v1017_v31 = vsel %vm321_vm6, %v1016_v30, -inf }
0x1084   : > { %1018 = vmax.xlane.f32.xlu2 %v1017_v31 }
0x108c   : > { %1744 = vrot.lane.b32.xlu1 %v1743_v14, %s1842_s12  ;;  %v1658_v14 = vld [vmem:[%s2389_s1 + $0x98] sm:$0xff] }
0x108d   : > { %1215 = vmatpush.msrb.mxu0 %v1658_v14 }
0x108f   : > { %1216 = vmatpush.msrb.mxu0 %v1656_v15 }
0x109c   : > { %1095 = vrot.lane.b32.xlu2 %v986_v21, %s1841_s11 }
0x10a4   : > { %1739 = vrot.lane.b32.xlu2 %v1738_v50, %s1842_s12 }
0x10e6   : > { %v1086_v32 = vpop.xlane.xlu1 %1085 }
0x10e7   : > { %v1087_v33 = vsub.f32 %v1083_v26, %v1086_v32  ;;  %v1191_v32 = vperm.slane %v2204_v18, 3 }
0x10e9   : > { %v1088_v34 = vmul.f32 1.442695, %v1087_v33 }
0x10eb   : > { %1808 = vpow2.f32 %v1088_v34 }
0x10f1   : > { %v1809_v35 = vpop.eup %1808 }
0x10f2   : > { %v1090_v37 = vsel %vm321_vm6, %v1809_v35, 0.0 }
0x10f3   : > { %1091 = vadd.xlane.f32.xlu0 %v1090_v37 }
0x10f7   : > { %v1019_v43 = vpop.xlane.xlu2 %1018 }
0x10f8   : > { %v1020_v38 = vsub.f32 %v1016_v30, %v1019_v43  ;;  %v1826_v43 = vld [vmem:[%s1887_s20] sm:$0xff] }
0x10f9   : > { %1353 = vrot.lane.b32.xlu1 %v1826_v43, %s1847_s5 }
0x10fa   : > { %v1021_v39 = vmul.f32 1.442695, %v1020_v38  ;;  %v1678_v38 = vld [vmem:[%s2390_s2 + $0x178] sm:$0xff] }
0x10fc   : > { %1810 = vpow2.f32 %v1021_v39  ;;  %v1677_v39 = vld [vmem:[%s2390_s2 + $0x170] sm:$0xff] }
0x10fe   : > { %v1745_v52 = vpop.permute.xlu1 %1744 }
0x10ff   : > { %v1096_v40 = vpop.permute.xlu2 %1095  ;;  %v1746_v55 = vunpack.i.l.bf16 %v1745_v52  ;;  %v1747_v57 = vunpack.i.h.bf16 %v1745_v52 }
0x1100   : > { %1116 = vmatpush.msrb.mxu2 %v1096_v40  ;;  %v1676_v40 = vld [vmem:[%s2390_s2 + $0x168] sm:$0xff] }
0x1101   : > { %1749 = vrot.lane.b32.xlu1 %v2246_v11, %s1838_s8 }
0x1102   : > { %v1811_v41 = vpop.eup %1810  ;;  %1266 = vmatpush.msra.mxu2 %v1678_v38  ;;  %v197_v38 = vld [vmem:[%s2391_s3 + $0x8] sm:$0xff] }
0x1103   : > { %v1023_v42 = vsel %vm321_vm6, %v1811_v41, 0.0 }
0x1104   : > { %1024 = vadd.xlane.f32.xlu0 %v1023_v42  ;;  %1267 = vmatpush.msra.mxu2 %v1677_v39  ;;  %v1675_v42 = vld [vmem:[%s2390_s2 + $0x160] sm:$0xff] }
0x1105   : > { %v196_v39 = vld [vmem:[%s2391_s3] sm:$0xff] }
0x1106   : > { %1268 = vmatpush.msra.mxu2 %v1676_v40  ;;  %v2340_v40 = vpack.i.bf16 %v196_v39, %v197_v38 }
0x1107   : > { %v1740_v51 = vpop.permute.xlu2 %1739 }
0x1108   : > { %v1742_v53 = vunpack.i.h.bf16 %v1740_v51  ;;  %v1741_v54 = vunpack.i.l.bf16 %v1740_v51  ;;  %1269 = vmatpush.msra.mxu2 %v1675_v42  ;;  %v1671_v51 = vld [vmem:[%s2390_s2 + $0x140] sm:$0xff] }
0x1109   : > { %1754 = vrot.lane.b32.xlu1 %v2340_v40, %s1838_s8 }
0x1118   : > { %1028 = vrot.lane.b32.xlu0 %v986_v21, %s1837_s7 }
0x1166   : > { %v1092_v44 = vpop.xlane.xlu0 %1091 }
0x1167   : > { %1812 = vrcp.f32 %v1092_v44  ;;  %v1674_v44 = vld [vmem:[%s2390_s2 + $0x158] sm:$0xff] }
0x1168   : > { %1270 = vmatpush.msra.mxu2 %v1674_v44 }
0x116d   : > { %v1813_v45 = vpop.eup %1812 }
0x116e   : > { %v1094_v46 = vmul.f32 %v1813_v45, %v1809_v35 }
0x1170   : > { %1685 = vmatmul.msk.f32.vlgmr.msrb.gmra.mxu2 %vm321_vm6, %v1094_v46 }
0x1177   : > { %v1025_v47 = vpop.xlane.xlu0 %1024 }
0x1178   : > { %1814 = vrcp.f32 %v1025_v47  ;;  %v1673_v47 = vld [vmem:[%s2390_s2 + $0x150] sm:$0xff] }
0x1179   : > { %1271 = vmatpush.msra.mxu2 %v1673_v47 }
0x117e   : > { %v1815_v48 = vpop.eup %1814 }
0x117f   : > { %v2228_v49 = vmul.f32 %v1815_v48, %v1811_v41  ;;  %v1197_v41 = vperm.slane %v2204_v18, 4 }
0x118a   : > { %v1029_v50 = vpop.permute.xlu0 %1028 }
0x118b   : > { %1049 = vmatpush.msra.mxu3 %v1029_v50 }
0x118c   : > { %1682 = vmatmul.msk.f32.vlgmr.msra.gmra.mxu3 %vm321_vm6, %v2228_v49 }
0x118d   : > { %1158 = vmatpush.msrb.mxu3 %v1741_v54 }
0x118f   : > { %1159 = vmatpush.msrb.mxu3 %v1742_v53  ;;  %v1670_v53 = vld [vmem:[%s2390_s2 + $0x138] sm:$0xff] }
0x1191   : > { %1160 = vmatpush.msrb.mxu3 %v1746_v55 }
0x1193   : > { %1161 = vmatpush.msrb.mxu3 %v1747_v57 }
0x1195   : > { %1301 = vmatpush.msra.mxu3 %v199_v3 }
0x1197   : > { %1302 = vmatpush.msra.mxu3 %v198_v4  ;;  %v1665_v4 = vld [vmem:[%s2390_s2 + $0x110] sm:$0xff] }
0x1199   : > { %1303 = vmatpush.msra.mxu3 %v197_v38 }
0x119b   : > { %1304 = vmatpush.msra.mxu3 %v196_v39 }
0x11f3   : > { %v1118_v56 = vpop.f32.mrf.mxu2 }
0x11f4   : > { %1122 = vrot.lane.b32.xlu2 %v1118_v56, %s1843_s13  ;;  %v1669_v56 = vld [vmem:[%s2390_s2 + $0x130] sm:$0xff] }
0x120f   : > { %v1051_v58 = vpop.f32.mrf.mxu3 }
0x124e   : > { %v1123_v59 = vpop.permute.xlu2 %1122 }
0x124f   : > { %v1125_v60 = vsel %vm289_vm5, %v1051_v58, %v1123_v59  ;;  %v1668_v59 = vld [vmem:[%s2390_s2 + $0x128] sm:$0xff] }
0x1250   : > { %1686 = vmatmul.msk.f32.vlgmr.msrb.gmra.mxu3 %vm204_vm0, %v1125_v60 }
0x12d3   : > { %v1163_v0 = vpop.f32.mrf.mxu3 }
0x12d4   : > { %v1164_v1 = vadd.f32 %v1163_v0, %v1126_v61  ;;  %v1667_v0 = vld [vmem:[%s2390_s2 + $0x120] sm:$0xff] }
0x12d6   : > { %v1166_v2 = vadd.f32 %v1164_v1, %v2197_v17 }
0x12d8   : > { %v1167_v36 = vsel %vm204_vm0, %v1166_v2, 0.0 }
0x12d9   : > { %1168 = vadd.xlane.f32.xlu0 %v1167_v36 }
0x134c   : > { %v1169_v5 = vpop.xlane.xlu0 %1168 }
0x134d   : > { %v1170_v6 = vmul.f32 %v1169_v5, %v1891_v8 }
0x134f   : > { %v1171_v7 = vsub.f32 %v1166_v2, %v1170_v6  ;;  %v1666_v2 = vld [vmem:[%s2390_s2 + $0x118] sm:$0xff]  ;;  %v1664_v6 = vld [vmem:[%s2390_s2 + $0x108] sm:$0xff] }
0x1351   : > { %v1172_v9 = vmul.f32 %v1171_v7, %v1171_v7 }
0x1353   : > { %v1173_v10 = vsel %vm204_vm0, %v1172_v9, 0.0  ;;  %v1663_v9 = vld [vmem:[%s2390_s2 + $0x100] sm:$0xff] }
0x1354   : > { %1174 = vadd.xlane.f32.xlu2 %v1173_v10 }
0x136c   : > { %1759 = vrot.lane.b32.xlu2 %v2246_v11, %s1837_s7 }
0x1374   : > { %1769 = vrot.lane.b32.xlu2 %v2246_v11, %s1845_s21 }
0x137c   : > { %1193 = vrot.lane.b32.xlu2 %v1094_v46, %s1846_s22 }
0x13c7   : > { %v1175_v16 = vpop.xlane.xlu2 %1174 }
0x13c8   : > { %v1176_v17 = vmul.f32 %v1175_v16, %v1891_v8 }
0x13ca   : > { %v1177_v19 = vadd.f32 1e-05, %v1176_v17 }
0x13cc   : > { %1816 = vrsqrt.f32 %v1177_v19  ;;  %vm1184_vm9 = vweird.f32 %v1177_v19 }
0x13cf   : > { %v1760_v20 = vpop.permute.xlu2 %1759 }
0x13d0   : > { %v1762_v21 = vunpack.i.h.bf16 %v1760_v20  ;;  %v1761_v63 = vunpack.i.l.bf16 %v1760_v20 }
0x13d2   : > { %v1817_v22 = vpop.eup %1816  ;;  %1344 = vmatpush.msra.mxu0 %v1761_v63 }
0x13d3   : > { %v1179_v23 = vmul.f32 %v1817_v22, %v1177_v19  ;;  %vm1185_vm5 = vweird.f32 %v1817_v22 }
0x13d4   : > { %1345 = vmatpush.msra.mxu0 %v1762_v21  ;;  %vm1186_vm10 = vmor %vm1184_vm9, %vm1185_vm5  ;;  %vm1528_vm9 = vcmask 523264  }
0x13d5   : > { %v1180_v24 = vmul.f32 %v1817_v22, %v1179_v23 }
0x13d7   : > { %v1181_v25 = vmul.f32 0.5, %v1180_v24  ;;  %v2266_v26 = vpop.permute.xlu2 %1769 }
0x13d9   : > { %v1182_v27 = vsub.f32 1.5, %v1181_v25 }
0x13db   : > { %v1183_v28 = vmul.f32 %v1817_v22, %v1182_v27 }
0x13dd   : > { %v1187_v30 = vsel %vm1186_vm10, %v1817_v22, %v1183_v28  ;;  %vm1530_vm10 = vcmask 654336  }
0x13de   : > { %v1188_v31 = vmul.f32 %v1187_v30, %v1171_v7 }
0x13df   : > { %v1194_v33 = vpop.permute.xlu2 %1193 }
0x13e0   : > { %v1190_v34 = vmul.f32 %v1189_v29, %v1188_v31  ;;  %v1196_v35 = vsel %vm321_vm6, %v2228_v49, %v1194_v33  ;;  %v1672_v49 = vld [vmem:[%s2390_s2 + $0x148] sm:$0xff] }
0x13e1   : > { %1524 = vrot.lane.b32.xlu2 %v1196_v35, %s1837_s7  ;;  %1272 = vmatpush.msra.mxu2 %v1672_v49 }
0x13e2   : > { %v2273_v37 = vadd.f32 %v1191_v32, %v1190_v34 }
0x13e3   : > { %1273 = vmatpush.msra.mxu2 %v1671_v51 }
0x13e4   : > { %1687 = vmatmul.msk.f32.vlgmr.msrb.gmra.mxu0 %vm204_vm0, %v2273_v37 }
0x13e5   : > { %1274 = vmatpush.msra.mxu2 %v1670_v53 }
0x13e7   : > { %1275 = vmatpush.msra.mxu2 %v1669_v56 }
0x13e9   : > { %1276 = vmatpush.msra.mxu2 %v1668_v59 }
0x13eb   : > { %1277 = vmatpush.msra.mxu2 %v1667_v0 }
0x13ed   : > { %1278 = vmatpush.msra.mxu2 %v1666_v2 }
0x13ef   : > { %1279 = vmatpush.msra.mxu2 %v1665_v4 }
0x13f1   : > { %1280 = vmatpush.msra.mxu2 %v1664_v6 }
0x13f3   : > { %1281 = vmatpush.msra.mxu2 %v1663_v9 }
0x1461   : > { %v1218_v45 = vpop.f32.mrf.mxu0 }
0x1462   : > { %v2294_v46 = vadd.f32 %v1218_v45, %v1197_v41  ;;  %v1265_v41 = vperm.slane %v2204_v18, 5  ;;  %v1354_v45 = vpop.permute.xlu1 %1353 }
0x1464   : > { %v1222_v48 = vmul.f32 %v2294_v46, %v2005_v62  ;;  %v1221_v34 = vmul.f32 0.5, %v2294_v46 }
0x1466   : > { %v1223_v50 = vmul.f32 %v1222_v48, %v1222_v48 }
0x1468   : > { %v1224_v52 = vmin.f32 %v1223_v50, 16.0 }
0x146a   : > { %v1225_v54 = vmul.f32 2.1237322e-06, %v1224_v52  ;;  %v1236_v55 = vmul.f32 3.8918573e-05, %v1224_v52  ;;  %v1750_v11 = vpop.permute.xlu1 %1749 }
0x146b   : > { %v1752_v46 = vunpack.i.h.bf16 %v1750_v11  ;;  %v1751_v47 = vunpack.i.l.bf16 %v1750_v11 }
0x146c   : > { %v1226_v57 = vadd.f32 0.00028619796, %v1225_v54  ;;  %v1237_v58 = vadd.f32 0.001143296, %v1236_v55 }
0x146d   : > { %1405 = vmatpush.msrb.mxu3 %v1751_v47 }
0x146e   : > { %v1227_v60 = vmul.f32 %v1226_v57, %v1224_v52  ;;  %v1238_v61 = vmul.f32 %v1237_v58, %v1224_v52 }
0x146f   : > { %1406 = vmatpush.msrb.mxu3 %v1752_v46 }
0x1470   : > { %v1239_v1 = vadd.f32 0.014752088, %v1238_v61  ;;  %v1228_v36 = vadd.f32 0.0036580483, %v1227_v60 }
0x1472   : > { %v1240_v3 = vmul.f32 %v1239_v1, %v1224_v52  ;;  %v1229_v7 = vmul.f32 %v1228_v36, %v1224_v52 }
0x1474   : > { %v1241_v5 = vadd.f32 0.112945676, %v1240_v3  ;;  %v1230_v13 = vadd.f32 0.05243302, %v1229_v7 }
0x1476   : > { %v1242_v10 = vmul.f32 %v1241_v5, %v1224_v52  ;;  %v1231_v16 = vmul.f32 %v1230_v13, %v1224_v52 }
0x1478   : > { %v1243_v12 = vadd.f32 0.4994258, %v1242_v10  ;;  %v1232_v17 = vadd.f32 0.18741608, %v1231_v16 }
0x147a   : > { %v1244_v14 = vmul.f32 %v1243_v12, %v1224_v52  ;;  %v1233_v20 = vmul.f32 %v1232_v17, %v1224_v52  ;;  %v2355_v52 = vld [vmem:[%s2391_s3 + $0x20] sm:$0xff] }
0x147b   : > { %v1377_v53 = vperm.slane %v2355_v52, 2 }
0x147c   : > { %v1245_v15 = vadd.f32 1.0, %v1244_v14  ;;  %v1234_v23 = vadd.f32 1.1283791, %v1233_v20 }
0x147e   : > { %1818 = vrcp.f32 %v1245_v15  ;;  %v1257_v22 = vand.u32 2147483648, %v1245_v15  ;;  %v1255_v25 = vand.u32 2147483647, %v1245_v15  ;;  %vm1251_vm12 = vweird.f32 %v1245_v15 }
0x147f   : > { %v1235_v29 = vmul.f32 %v1234_v23, %v1222_v48  ;;  %v1755_v48 = vpop.permute.xlu1 %1754 }
0x1480   : > { %v1258_v28 = vor.u32 1.1754944e-38, %v1257_v22  ;;  %vm1256_vm14 = vcmp.eq.f32.partialorder %v1255_v25, 8.507059e+37  ;;  %v1757_v49 = vunpack.i.h.bf16 %v1755_v48  ;;  %v1756_v50 = vunpack.i.l.bf16 %v1755_v48 }
0x1481   : > { %v1771_v48 = vunpack.i.l.bf16 %v2266_v26 }
0x1482   : > { %1407 = vmatpush.msrb.mxu3 %v1756_v50 }
0x1484   : > { %v1819_v19 = vpop.eup %1818  ;;  %1408 = vmatpush.msrb.mxu3 %v1757_v49  ;;  %v1772_v49 = vunpack.i.h.bf16 %v2266_v26 }
0x1485   : > { %v1247_v21 = vmul.f32 %v1819_v19, %v1245_v15  ;;  %vm1252_vm11 = vweird.f32 %v1819_v19 }
0x1486   : > { %vm1253_vm13 = vmor %vm1251_vm12, %vm1252_vm11  ;;  %vm1536_vm11 = vcmask 326656   ;;  %vm1542_vm12 = vcmask 1040384  }
0x1487   : > { %v1248_v63 = vsub.f32 1.0, %v1247_v21 }
0x1489   : > { %v1249_v24 = vmul.f32 %v1819_v19, %v1248_v63 }
0x148b   : > { %v1250_v27 = vadd.f32 %v1819_v19, %v1249_v24 }
0x148d   : > { %v1254_v30 = vsel %vm1253_vm13, %v1819_v19, %v1250_v27  ;;  %vm1544_vm13 = vcmask 1043456  }
0x148e   : > { %v1259_v31 = vsel %vm1256_vm14, %v1258_v28, %v1254_v30 }
0x148f   : > { %v1260_v32 = vmul.f32 %v1259_v31, %v1235_v29 }
0x1491   : > { %v1688_v33 = vclamps-f32 %v1260_v32, 1.0 }
0x1493   : > { %v1263_v35 = vadd.f32 1.0, %v1688_v33 }
0x1495   : > { %v1264_v43 = vmul.f32 %v1263_v35, %v1221_v34 }
0x1497   : > { %1282 = vmatmul.f32.vlgmr.msra.gmra.mxu2 %v1264_v43 }
0x151a   : > { %v1283_v42 = vpop.f32.mrf.mxu2 }
0x151b   : > { %v2345_v44 = vadd.f32 %v1283_v42, %v1265_v41 }
0x151d   : > { %1689 = vmatmul.msk.f32.vlgmr.msra.gmra.mxu3 %vm204_vm0, %v2345_v44  ;;  %1372 = vmatpush.msrb.mxu1 %v2345_v44 }
0x151e   : > { %1691 = vmatmul.msk.f32.vlgmr.msrb.gmra.mxu1 %vm321_vm6, %v1354_v45 }
0x159b   : > { %v1374_v18 = vpop.f32.mrf.mxu1 }
0x159c   : > { %1692 = vmatmul.msk.f32.vlgmr.msrb.gmra.mxu3 %vm204_vm0, %v1374_v18 }
0x15a0   : > { %v1306_v51 = vpop.f32.mrf.mxu3 }
0x15a1   : > { %v1307_v35 = vadd.f32 %v2355_v52, %v1306_v51 }
0x161f   : > { %v1410_v54 = vpop.f32.mrf.mxu3 }
0x1620   : > { %v1411_v55 = vadd.f32 %v1410_v54, %v1377_v53 }
0x1622   : > { %v1414_v56 = vmul.f32 %v1411_v55, %v2005_v62  ;;  %v1413_v31 = vmul.f32 0.5, %v1411_v55 }
0x1624   : > { %v1415_v57 = vmul.f32 %v1414_v56, %v1414_v56 }
0x1626   : > { %v1416_v58 = vmin.f32 %v1415_v57, 16.0 }
0x1628   : > { %v1417_v59 = vmul.f32 2.1237322e-06, %v1416_v58  ;;  %v1428_v60 = vmul.f32 3.8918573e-05, %v1416_v58 }
0x162a   : > { %v1418_v61 = vadd.f32 0.00028619796, %v1417_v59  ;;  %v1429_v0 = vadd.f32 0.001143296, %v1428_v60  ;;  %v1480_v60 = vperm.slane %v2355_v52, 3 }
0x162c   : > { %v1419_v1 = vmul.f32 %v1418_v61, %v1416_v58  ;;  %v1430_v2 = vmul.f32 %v1429_v0, %v1416_v58  ;;  %v1482_v0 = vperm.slane %v2355_v52, 4 }
0x162e   : > { %v1431_v36 = vadd.f32 0.014752088, %v1430_v2  ;;  %v1420_v3 = vadd.f32 0.0036580483, %v1419_v1  ;;  %v1525_v1 = vpop.permute.xlu2 %1524 }
0x1630   : > { %v1432_v4 = vmul.f32 %v1431_v36, %v1416_v58  ;;  %v1421_v6 = vmul.f32 %v1420_v3, %v1416_v58 }
0x1632   : > { %v1433_v5 = vadd.f32 0.112945676, %v1432_v4  ;;  %v1422_v10 = vadd.f32 0.05243302, %v1421_v6 }
0x1634   : > { %v1434_v7 = vmul.f32 %v1433_v5, %v1416_v58  ;;  %v1423_v14 = vmul.f32 %v1422_v10, %v1416_v58 }
0x1636   : > { %v1435_v9 = vadd.f32 0.4994258, %v1434_v7  ;;  %v1424_v62 = vadd.f32 0.18741608, %v1423_v14  ;;  %v1327_v7 = vrot.slane %v2355_v52, 1 }
0x1638   : > { %v1436_v12 = vmul.f32 %v1435_v9, %v1416_v58  ;;  %v1425_v16 = vmul.f32 %v1424_v62, %v1416_v58  ;;  %v1484_v9 = vperm.slane %v2355_v52, 5 }
0x163a   : > { %v1437_v13 = vadd.f32 1.0, %v1436_v12  ;;  %v1426_v21 = vadd.f32 1.1283791, %v1425_v16 }
0x163c   : > { %1820 = vrcp.f32 %v1437_v13  ;;  %v1449_v20 = vand.u32 2147483648, %v1437_v13  ;;  %v1447_v22 = vand.u32 2147483647, %v1437_v13  ;;  %vm1443_vm1 = vweird.f32 %v1437_v13 }
0x163d   : > { %v1427_v25 = vmul.f32 %v1426_v21, %v1414_v56  ;;  %1822 = vtanh.f32 %v1307_v35 }
0x163e   : > { %v1450_v24 = vor.u32 1.1754944e-38, %v1449_v20  ;;  %vm1448_vm3 = vcmp.eq.f32.partialorder %v1447_v22, 8.507059e+37 }
0x1642   : > { %v1821_v15 = vpop.eup %1820 }
0x1643   : > { %v1439_v17 = vmul.f32 %v1821_v15, %v1437_v13  ;;  %vm1444_vm15 = vweird.f32 %v1821_v15  ;;  %v1823_v43 = vpop.eup %1822 }
0x1644   : > { %vm1445_vm2 = vmor %vm1443_vm1, %vm1444_vm15 }
0x1645   : > { %v1440_v19 = vsub.f32 1.0, %v1439_v17 }
0x1647   : > { %v1441_v63 = vmul.f32 %v1821_v15, %v1440_v19 }
0x1649   : > { %v1442_v23 = vadd.f32 %v1821_v15, %v1441_v63 }
0x164b   : > { %v1446_v27 = vsel %vm1445_vm2, %v1821_v15, %v1442_v23 }
0x164c   : > { %v1451_v28 = vsel %vm1448_vm3, %v1450_v24, %v1446_v27 }
0x164d   : > { %v1452_v29 = vmul.f32 %v1451_v28, %v1427_v25 }
0x164f   : > { %v1693_v30 = vclamps-f32 %v1452_v29, 1.0 }
0x1651   : > { %v1455_v32 = vadd.f32 1.0, %v1693_v30 }
0x1653   : > { %v1456_v33 = vmul.f32 %v1455_v32, %v1413_v31 }
0x1655   : > { %v1458_v34 = vsel %vm1457_vm4, %v1456_v33, 0.0 }
0x1656   : > { %1459 = vadd.xlane.f32.xlu0 %v1458_v34 }
0x166a   : > { %1764 = vrot.lane.b32.xlu0 %v2340_v40, %s1837_s7  ;;  %s1697_s7 = sshll.u32 %s2394_s16, 4 }
0x1672   : > { %1774 = vrot.lane.b32.xlu0 %v2340_v40, %s1845_s21 }
0x167a   : > { %1532 = vrot.lane.b32.xlu0 %v1823_v43, %s1846_s22  ;;  %s194_s22 = scalar_lea.vmem %s2392_s4, %s1697_s7 }
0x16c9   : > { %v1460_v38 = vpop.xlane.xlu0 %1459 }
0x16ca   : > { %v1461_v39 = vmul.f32 %v1460_v38, %v1891_v8 }
0x16cc   : > { %v1462_v41 = vsub.f32 %v1456_v33, %v1461_v39 }
0x16ce   : > { %v1463_v42 = vmul.f32 %v1462_v41, %v1462_v41 }
0x16d0   : > { %v1464_v45 = vsel %vm1457_vm4, %v1463_v42, 0.0 }
0x16d1   : > { %1465 = vadd.xlane.f32.xlu1 %v1464_v45 }
0x16dc   : > { %v1765_v11 = vpop.permute.xlu0 %1764 }
0x16dd   : > { %v1767_v46 = vunpack.i.h.bf16 %v1765_v11  ;;  %v1766_v47 = vunpack.i.l.bf16 %v1765_v11 }
0x16df   : > { %1346 = vmatpush.msra.mxu0 %v1766_v47 }
0x16e1   : > { %1347 = vmatpush.msra.mxu0 %v1767_v46 }
0x16e2   : > { %1690 = vmatmul.msk.f32.vlgmr.msra.gmra.mxu0 %vm204_vm0, %v1823_v43 }
0x16e3   : > { %1512 = vmatpush.msrb.mxu0 %v1771_v48 }
0x16e4   : > { %v1775_v40 = vpop.permute.xlu0 %1774 }
0x16e5   : > { %v1777_v50 = vunpack.i.h.bf16 %v1775_v40  ;;  %v1776_v18 = vunpack.i.l.bf16 %v1775_v40  ;;  %1513 = vmatpush.msrb.mxu0 %v1772_v49 }
0x16e7   : > { %1514 = vmatpush.msrb.mxu0 %v1776_v18 }
0x16e9   : > { %1515 = vmatpush.msrb.mxu0 %v1777_v50 }
0x16ea   : > { %1520 = vrot.lane.b32.xlu1 %v2273_v37, %s1842_s12 }
0x16ec   : > { %v1533_v13 = vpop.permute.xlu0 %1532 }
0x1744   : > { %v1466_v51 = vpop.xlane.xlu1 %1465 }
0x1745   : > { %v1467_v53 = vmul.f32 %v1466_v51, %v1891_v8 }
0x1747   : > { %v1468_v54 = vadd.f32 1e-05, %v1467_v53 }
0x1749   : > { %1824 = vrsqrt.f32 %v1468_v54  ;;  %vm1475_vm8 = vweird.f32 %v1468_v54 }
0x174f   : > { %v1825_v26 = vpop.eup %1824 }
0x1750   : > { %v1470_v55 = vmul.f32 %v1825_v26, %v1468_v54  ;;  %vm1476_vm7 = vweird.f32 %v1825_v26 }
0x1751   : > { %vm1477_vm5 = vmor %vm1475_vm8, %vm1476_vm7 }
0x1752   : > { %v1471_v56 = vmul.f32 %v1825_v26, %v1470_v55 }
0x1754   : > { %v1472_v57 = vmul.f32 0.5, %v1471_v56 }
0x1756   : > { %v1473_v58 = vsub.f32 1.5, %v1472_v57 }
0x1758   : > { %v1474_v59 = vmul.f32 %v1825_v26, %v1473_v58 }
0x175a   : > { %v1478_v61 = vsel %vm1477_vm5, %v1825_v26, %v1474_v59 }
0x175b   : > { %v1479_v37 = vmul.f32 %v1478_v61, %v1462_v41 }
0x175c   : > { %v1521_v8 = vpop.permute.xlu1 %1520 }
0x175d   : > { %v1481_v2 = vmul.f32 %v1480_v60, %v1479_v37  ;;  %v1527_v36 = vsel %vm204_vm0, %v2345_v44, %v1521_v8 }
0x175e   : > { %v1529_v3 = vsel %vm1528_vm9, %v1527_v36, %v1525_v1 }
0x175f   : > { %v1531_v4 = vsel %vm1530_vm10, %v1529_v3, 0.0  ;;  %v1483_v5 = vadd.f32 %v1482_v0, %v1481_v2  ;;  %v1349_v6 = vpop.f32.mrf.mxu0 }
0x1760   : > { %1546 = vst [vmem:[%s194_s22] sm:$0xff] %v1531_v4  ;;  %v1350_v10 = vadd.f32 %v1349_v6, %v1327_v7 }
0x1761   : > { %1694 = vmatmul.msk.f32.vlgmr.msrb.gmra.mxu0 %vm204_vm0, %v1483_v5 }
0x1762   : > { %v1535_v62 = vsel %vm321_vm6, %v1350_v10, %v1533_v13 }
0x1763   : > { %v1537_v16 = vsel %vm1536_vm11, %v1535_v62, 0.0 }
0x17de   : > { %v1517_v12 = vpop.f32.mrf.mxu0 }
0x17df   : > { %v1518_v14 = vadd.f32 %v1517_v12, %v1484_v9 }
0x17e1   : > { %v1538_v44 = vsel %vm321_vm6, %v1518_v14, 0.0 }
0x17e2   : > { %v1540_v15 = vrot.slane %v1538_v44, 7 }
0x17e4   : > { %v1543_v17 = vsel %vm1542_vm12, %v1537_v16, %v1540_v15 }
0x17e5   : > { %v1545_v19 = vsel %vm1544_vm13, %v1543_v17, 0.0 }
0x17e6   : > { %1547 = vst [vmem:[%s194_s22 + $0x8] sm:$0xff] %v1545_v19 }
0x17e7 PF: > { %s14_s15 = sadd.s32 1, %s1834_s15  }
0x17e8   : > { %p11_p4 = scmp.ge.s32.totalorder %s14_s15, 4  }
0x17ea   :  { %13 = sbr.rel (!%p11_p4) target bundleno = 1 (0x1), region = 70 }

</bundles_post_ra>
